<compile_context>
chip_gen: v7x
topology: tpu7x:2x2x1
jax: 0.10.0
libtpu: 0.0.40
codegen_flags: <defaults>
</compile_context>

<pallas_src>
import functools

import jax
import jax.numpy as jnp
from jax.experimental import pallas as pl
from jax.experimental.pallas import tpu as pltpu

KSIZE = 7
PAD = KSIZE // 2
KK = KSIZE * KSIZE


def _shift_lanes(x, s):
    """y[..., i] = x[..., i + s] if 0 <= i + s < n else 0  (s is a static int)."""
    n = x.shape[-1]
    if s == 0:
        return x
    if abs(s) >= n:
        return jnp.zeros_like(x)
    zeros = jnp.zeros(x.shape[:-1] + (abs(s),), x.dtype)
    if s > 0:
        return jnp.concatenate([x[:, s:], zeros], axis=1)
    return jnp.concatenate([zeros, x[:, : n + s]], axis=1)


def _spatial_attention_kernel(x_ref, w_ref, cmask_ref, o_ref, sum_ref, max_ref,
                              *, c_total, c_rem, width):
    # x_ref     : VMEM (tc, HW)  -- one channel block of one image (N squeezed)
    # w_ref     : SMEM (2*7*7,)  -- conv1 weights flattened (out=1, in=2, 7, 7)
    # cmask_ref : VMEM (7, HW)   -- {0,1} column-validity masks per conv dx
    # o_ref     : VMEM (1, HW)   -- attention map for this image
    # sum_ref, max_ref : VMEM (1, HW) f32 -- running channel sum / max
    c = pl.program_id(1)
    nc = pl.num_programs(1)
    hw = x_ref.shape[-1]

    def reduce_block(xb):
        # One load of the block feeds both reductions; sum accumulates in f32.
        s = jnp.sum(xb, axis=0, keepdims=True, dtype=jnp.float32)
        m = jnp.max(xb, axis=0, keepdims=True).astype(jnp.float32)
        return s, m

    def accumulate(s_blk, m_blk):
        @pl.when(c == 0)
        def _():                      # first block: direct write, no init + RMW
            sum_ref[...] = s_blk
            max_ref[...] = m_blk

        @pl.when(c != 0)
        def _():
            sum_ref[...] = sum_ref[...] + s_blk
            max_ref[...] = jnp.maximum(max_ref[...], m_blk)

    if c_rem == 0:
        accumulate(*reduce_block(x_ref[...]))
    else:
        @pl.when(c != nc - 1)
        def _():
            accumulate(*reduce_block(x_ref[...]))

        @pl.when(c == nc - 1)         # partial last block: static sub-slice
        def _():
            accumulate(*reduce_block(x_ref[:c_rem, :]))

    @pl.when(c == nc - 1)
    def _finalize():
        avg = sum_ref[...] * (1.0 / c_total)      # channel mean, (1, HW) f32
        mx = max_ref[...]                         # channel max,  (1, HW) f32

        # 7x7 conv over (avg, max) in flattened space: on-the-fly zero-filled
        # lane shifts, accumulated immediately (few live full-size arrays).
        acc = jnp.zeros((1, hw), jnp.float32)
        for dx in range(KSIZE):
            ox = dx - PAD
            if ox == 0:
                a_dx, m_dx = avg, mx
            else:
                cm = cmask_ref[pl.ds(dx, 1), :]          # (1, HW) {0,1}
                a_dx = _shift_lanes(avg, ox) * cm
                m_dx = _shift_lanes(mx, ox) * cm
            for dy in range(KSIZE):
                oy = dy - PAD
                w_a = w_ref[0 * KK + dy * KSIZE + dx]
                w_m = w_ref[1 * KK + dy * KSIZE + dx]
                t = w_a * a_dx + w_m * m_dx
                # Row shift by a multiple of W: zero fill at the array ends is
                # exactly the zero padding of the conv in the y direction.
                acc = acc + _shift_lanes(t, oy * width)

        o_ref[...] = jax.nn.sigmoid(acc).astype(o_ref.dtype)


def _pick_channel_tile(C, bytes_per_channel, budget_bytes, sublane):
    """Channel tile chosen by VMEM budget (multiple of the sublane count)."""
    max_tc = budget_bytes // max(1, bytes_per_channel)
    if max_tc >= C or C <= sublane:
        return C
    return max(sublane, (max_tc // sublane) * sublane)


def _default_block_budget_bytes():
    try:
        kind = jax.devices()[0].device_kind.lower()
    except Exception:
        kind = ""
    if "v6" in kind:          # v6e: 128 MiB physical VMEM -> large blocks
        return 16 << 20
    if "v5" in kind:          # v5e/v5p: 16 MiB scoped default, raise explicitly
        return 8 << 20
    return 8 << 20            # v7x (64 MiB VMEM) / unknown: conservative


@functools.partial(jax.jit, static_argnames=("block_budget_bytes",))
def spatial_attention(x, conv1_weight, *, block_budget_bytes=None):
    """x: (N, C, H, W); conv1_weight: (1, 2, 7, 7). Returns (N, 1, H, W)."""
    N, C, H, W = x.shape
    HW = H * W
    if block_budget_bytes is None:
        block_budget_bytes = _default_block_budget_bytes()

    # Lane-dense views: flatten the spatial dims (free on contiguous NCHW).
    x_flat = x.reshape(N, C, HW)
    w_flat = conv1_weight.reshape(-1).astype(jnp.float32)        # (98,) -> SMEM

    # {0,1} column-validity masks for each horizontal conv offset: (7, HW).
    col = jnp.arange(HW, dtype=jnp.int32) % W
    cmask = jnp.stack(
        [((col + (dx - PAD) >= 0) & (col + (dx - PAD) < W)).astype(jnp.float32)
         for dx in range(KSIZE)], axis=0)

    itemsize = x.dtype.itemsize
    sublane = max(1, 32 // itemsize)      # 8 for f32, 16 for bf16, 32 for int8
    bytes_per_channel = HW * itemsize
    tc = _pick_channel_tile(C, bytes_per_channel, block_budget_bytes, sublane)
    n_cb = pl.cdiv(C, tc)
    c_rem = C % tc

    block_bytes = tc * HW * itemsize
    vmem_limit = int(2 * block_bytes              # double-buffered input block
                     + 6 * HW * 4                 # scratch + output + temps
                     + 2 * KSIZE * HW * 4         # column masks
                     + (4 << 20))                 # headroom

    kernel = functools.partial(_spatial_attention_kernel,
                               c_total=C, c_rem=c_rem, width=W)

    cost = pl.CostEstimate(
        flops=int(3 * N * C * HW + 4 * KK * N * HW),
        transcendentals=int(N * HW),
        bytes_accessed=int(N * C * HW * itemsize + N * HW * itemsize
                           + w_flat.size * 4 + cmask.size * 4),
    )

    out_flat = pl.pallas_call(
        kernel,
        out_shape=jax.ShapeDtypeStruct((N, 1, HW), x.dtype),
        grid=(N, n_cb),
        in_specs=[
            pl.BlockSpec((pl.Squeezed(), tc, HW), lambda n, c: (n, c, 0)),
            pl.BlockSpec(memory_space=pltpu.MemorySpace.SMEM),
            pl.BlockSpec((KSIZE, HW), lambda n, c: (0, 0)),
        ],
        out_specs=pl.BlockSpec((pl.Squeezed(), 1, HW), lambda n, c: (n, 0, 0)),
        scratch_shapes=[
            pltpu.VMEM((1, HW), jnp.float32),   # running channel sum
            pltpu.VMEM((1, HW), jnp.float32),   # running channel max
        ],
        compiler_params=pltpu.CompilerParams(
            dimension_semantics=("parallel", "arbitrary"),
            vmem_limit_bytes=vmem_limit,
        ),
        cost_estimate=cost,
    )(x_flat, w_flat, cmask)

    return out_flat.reshape(N, 1, H, W)


def _reference(x, conv1_weight):
    # Pure-JAX reference for sanity checking.
    avg_out = jnp.mean(x, axis=1, keepdims=True)
    max_out = jnp.max(x, axis=1, keepdims=True)
    cat = jnp.concatenate([avg_out, max_out], axis=1)  # (N, 2, H, W)
    out = jax.lax.conv_general_dilated(
        cat, conv1_weight,
        window_strides=(1, 1),
        padding=((PAD, PAD), (PAD, PAD)),
        dimension_numbers=("NCHW", "OIHW", "NCHW"),
    )
    return jax.nn.sigmoid(out)


if __name__ == "__main__":
    key = jax.random.PRNGKey(0)
    kx, kw = jax.random.split(key)

    # Small example consistent with the module: batch=2, channels=4, spatial=16.
    x = jax.random.normal(kx, (2, 4, 16, 16), dtype=jnp.float32)

    # Deterministic Conv2d(2, 1, 7, bias=False) weights (kaiming-uniform-like scale).
    fan_in = 2 * KSIZE * KSIZE
    bound = (6.0 / fan_in) ** 0.5
    conv1_weight = jax.random.uniform(
        kw, (1, 2, KSIZE, KSIZE), dtype=jnp.float32, minval=-bound, maxval=bound
    )

    out = spatial_attention(x, conv1_weight)
    out = jax.block_until_ready(out)

    ref = _reference(x, conv1_weight)
    assert out.shape == (2, 1, 16, 16)
    assert jnp.allclose(out, ref, atol=1e-5, rtol=1e-5), float(
        jnp.max(jnp.abs(out - ref))
    )

    print("KERNEL_OK")
</pallas_src>

<mosaic_0001>
module attributes {stable_mosaic.version = 11 : i64} {
  func.func @_spatial_attention_kernel(%arg0: i32, %arg1: i32, %arg2: memref<1x4x256xf32, #tpu.memory_space<vmem>>, %arg3: memref<98xf32, #tpu.memory_space<smem>>, %arg4: memref<7x256xf32, #tpu.memory_space<vmem>>, %arg5: memref<1x1x256xf32, #tpu.memory_space<vmem>>, %arg6: memref<1x256xf32, #tpu.memory_space<vmem>>, %arg7: memref<1x256xf32, #tpu.memory_space<vmem>>) attributes {dimension_semantics = [#tpu.dimension_semantics<parallel>, #tpu.dimension_semantics<arbitrary>], iteration_bounds = array<i64: 2, 1>, scalar_prefetch = 0 : i64, scratch_operands = 2 : i64, tpu.core_type = #tpu.core_type<tc>, window_params = [{transform_indices = @transform_0, window_bounds = array<i64: 1, 4, 256>}, {transform_indices = @transform_1, window_bounds = array<i64: 98>}, {pipeline_mode = #tpu.pipeline_mode<synchronous>, transform_indices = @transform_2, window_bounds = array<i64: 7, 256>}, {transform_indices = @transform_3, window_bounds = array<i64: 1, 1, 256>}]} {
    %c0 = arith.constant 0 : index
    %c0_0 = arith.constant 0 : index
    %c0_1 = arith.constant 0 : index
    %0 = vector.load %arg2[%c0, %c0_0, %c0_1] : memref<1x4x256xf32, #tpu.memory_space<vmem>>, vector<1x4x256xf32>
    %1 = vector.shape_cast %0 : vector<1x4x256xf32> to vector<4x256xf32>
    %cst = arith.constant dense<0.000000e+00> : vector<256xf32>
    %2 = vector.multi_reduction <add>, %1, %cst [0] : vector<4x256xf32> to vector<256xf32>
    %3 = vector.shape_cast %2 : vector<256xf32> to vector<1x256xf32>
    %cst_2 = arith.constant dense<0xFF800000> : vector<256xf32>
    %4 = vector.multi_reduction <maximumf>, %1, %cst_2 [0] : vector<4x256xf32> to vector<256xf32>
    %5 = vector.shape_cast %4 : vector<256xf32> to vector<1x256xf32>
    %c0_i32 = arith.constant 0 : i32
    %6 = arith.cmpi eq, %arg1, %c0_i32 : i32
    %7 = arith.extui %6 : i1 to i32
    %c0_i32_3 = arith.constant 0 : i32
    %8 = arith.cmpi ne, %7, %c0_i32_3 : i32
    scf.if %8 {
      %c0_8 = arith.constant 0 : index
      %c0_9 = arith.constant 0 : index
      %15 = vector.load %arg6[%c0_8, %c0_9] : memref<1x256xf32, #tpu.memory_space<vmem>>, vector<1x256xf32>
      tpu.vector_store %arg6[%c0_8, %c0_9], %3 {strides = array<i32>} : memref<1x256xf32, #tpu.memory_space<vmem>>, vector<1x256xf32>,
      %c0_10 = arith.constant 0 : index
      %c0_11 = arith.constant 0 : index
      %16 = vector.load %arg7[%c0_10, %c0_11] : memref<1x256xf32, #tpu.memory_space<vmem>>, vector<1x256xf32>
      tpu.vector_store %arg7[%c0_10, %c0_11], %5 {strides = array<i32>} : memref<1x256xf32, #tpu.memory_space<vmem>>, vector<1x256xf32>,
    } else {
    }
    %c0_i32_4 = arith.constant 0 : i32
    %9 = arith.cmpi ne, %arg1, %c0_i32_4 : i32
    %10 = arith.extui %9 : i1 to i32
    %c0_i32_5 = arith.constant 0 : i32
    %11 = arith.cmpi ne, %10, %c0_i32_5 : i32
    scf.if %11 {
      %c0_8 = arith.constant 0 : index
      %c0_9 = arith.constant 0 : index
      %15 = vector.load %arg6[%c0_8, %c0_9] : memref<1x256xf32, #tpu.memory_space<vmem>>, vector<1x256xf32>
      %16 = arith.addf %15, %3 : vector<1x256xf32>
      %c0_10 = arith.constant 0 : index
      %c0_11 = arith.constant 0 : index
      %17 = vector.load %arg6[%c0_10, %c0_11] : memref<1x256xf32, #tpu.memory_space<vmem>>, vector<1x256xf32>
      tpu.vector_store %arg6[%c0_10, %c0_11], %16 {strides = array<i32>} : memref<1x256xf32, #tpu.memory_space<vmem>>, vector<1x256xf32>,
      %c0_12 = arith.constant 0 : index
      %c0_13 = arith.constant 0 : index
      %18 = vector.load %arg7[%c0_12, %c0_13] : memref<1x256xf32, #tpu.memory_space<vmem>>, vector<1x256xf32>
      %19 = arith.maximumf %18, %5 : vector<1x256xf32>
      %c0_14 = arith.constant 0 : index
      %c0_15 = arith.constant 0 : index
      %20 = vector.load %arg7[%c0_14, %c0_15] : memref<1x256xf32, #tpu.memory_space<vmem>>, vector<1x256xf32>
      tpu.vector_store %arg7[%c0_14, %c0_15], %19 {strides = array<i32>} : memref<1x256xf32, #tpu.memory_space<vmem>>, vector<1x256xf32>,
    } else {
    }
    %c0_i32_6 = arith.constant 0 : i32
    %12 = arith.cmpi eq, %arg1, %c0_i32_6 : i32
    %13 = arith.extui %12 : i1 to i32
    %c0_i32_7 = arith.constant 0 : i32
    %14 = arith.cmpi ne, %13, %c0_i32_7 : i32
    scf.if %14 {
      %c0_8 = arith.constant 0 : index
      %c0_9 = arith.constant 0 : index
      %15 = vector.load %arg6[%c0_8, %c0_9] : memref<1x256xf32, #tpu.memory_space<vmem>>, vector<1x256xf32>
      %cst_10 = arith.constant 2.500000e-01 : f32
      %16 = vector.broadcast %cst_10 : f32 to vector<1x256xf32>
      %17 = arith.mulf %15, %16 : vector<1x256xf32>
      %c0_11 = arith.constant 0 : index
      %c0_12 = arith.constant 0 : index
      %18 = vector.load %arg7[%c0_11, %c0_12] : memref<1x256xf32, #tpu.memory_space<vmem>>, vector<1x256xf32>
      %cst_13 = arith.constant 0.000000e+00 : f32
      %19 = vector.broadcast %cst_13 : f32 to vector<1x256xf32>
      %c0_14 = arith.constant 0 : index
      %c0_15 = arith.constant 0 : index
      %20 = vector.load %arg4[%c0_14, %c0_15] : memref<7x256xf32, #tpu.memory_space<vmem>>, vector<1x256xf32>
      %cst_16 = arith.constant 0.000000e+00 : f32
      %21 = vector.broadcast %cst_16 : f32 to vector<1x3xf32>
      %22 = vector.extract_strided_slice %17 {offsets = [0, 0], sizes = [1, 253], strides = [1, 1]} : vector<1x256xf32> to vector<1x253xf32>
      %23 = tpu.concatenate %21, %22 in 1 : vector<1x3xf32>, vector<1x253xf32> -> vector<1x256xf32>
      %24 = arith.mulf %23, %20 : vector<1x256xf32>
      %cst_17 = arith.constant 0.000000e+00 : f32
      %25 = vector.broadcast %cst_17 : f32 to vector<1x3xf32>
      %26 = vector.extract_strided_slice %18 {offsets = [0, 0], sizes = [1, 253], strides = [1, 1]} : vector<1x256xf32> to vector<1x253xf32>
      %27 = tpu.concatenate %25, %26 in 1 : vector<1x3xf32>, vector<1x253xf32> -> vector<1x256xf32>
      %28 = arith.mulf %27, %20 : vector<1x256xf32>
      %c0_18 = arith.constant 0 : index
      %29 = memref.load %arg3[%c0_18] : memref<98xf32, #tpu.memory_space<smem>>
      %c49 = arith.constant 49 : index
      %30 = memref.load %arg3[%c49] : memref<98xf32, #tpu.memory_space<smem>>
      %31 = vector.broadcast %29 : f32 to vector<1x256xf32>
      %32 = arith.mulf %31, %24 : vector<1x256xf32>
      %33 = vector.broadcast %30 : f32 to vector<1x256xf32>
      %34 = arith.mulf %33, %28 : vector<1x256xf32>
      %35 = arith.addf %32, %34 : vector<1x256xf32>
      %cst_19 = arith.constant 0.000000e+00 : f32
      %36 = vector.broadcast %cst_19 : f32 to vector<1x48xf32>
      %37 = vector.extract_strided_slice %35 {offsets = [0, 0], sizes = [1, 208], strides = [1, 1]} : vector<1x256xf32> to vector<1x208xf32>
      %38 = tpu.concatenate %36, %37 in 1 : vector<1x48xf32>, vector<1x208xf32> -> vector<1x256xf32>
      %39 = arith.addf %19, %38 : vector<1x256xf32>
      %c7 = arith.constant 7 : index
      %40 = memref.load %arg3[%c7] : memref<98xf32, #tpu.memory_space<smem>>
      %c56 = arith.constant 56 : index
      %41 = memref.load %arg3[%c56] : memref<98xf32, #tpu.memory_space<smem>>
      %42 = vector.broadcast %40 : f32 to vector<1x256xf32>
      %43 = arith.mulf %42, %24 : vector<1x256xf32>
      %44 = vector.broadcast %41 : f32 to vector<1x256xf32>
      %45 = arith.mulf %44, %28 : vector<1x256xf32>
      %46 = arith.addf %43, %45 : vector<1x256xf32>
      %cst_20 = arith.constant 0.000000e+00 : f32
      %47 = vector.broadcast %cst_20 : f32 to vector<1x32xf32>
      %48 = vector.extract_strided_slice %46 {offsets = [0, 0], sizes = [1, 224], strides = [1, 1]} : vector<1x256xf32> to vector<1x224xf32>
      %49 = tpu.concatenate %47, %48 in 1 : vector<1x32xf32>, vector<1x224xf32> -> vector<1x256xf32>
      %50 = arith.addf %39, %49 : vector<1x256xf32>
      %c14 = arith.constant 14 : index
      %51 = memref.load %arg3[%c14] : memref<98xf32, #tpu.memory_space<smem>>
      %c63 = arith.constant 63 : index
      %52 = memref.load %arg3[%c63] : memref<98xf32, #tpu.memory_space<smem>>
      %53 = vector.broadcast %51 : f32 to vector<1x256xf32>
      %54 = arith.mulf %53, %24 : vector<1x256xf32>
      %55 = vector.broadcast %52 : f32 to vector<1x256xf32>
      %56 = arith.mulf %55, %28 : vector<1x256xf32>
      %57 = arith.addf %54, %56 : vector<1x256xf32>
      %cst_21 = arith.constant 0.000000e+00 : f32
      %58 = vector.broadcast %cst_21 : f32 to vector<1x16xf32>
      %59 = vector.extract_strided_slice %57 {offsets = [0, 0], sizes = [1, 240], strides = [1, 1]} : vector<1x256xf32> to vector<1x240xf32>
      %60 = tpu.concatenate %58, %59 in 1 : vector<1x16xf32>, vector<1x240xf32> -> vector<1x256xf32>
      %61 = arith.addf %50, %60 : vector<1x256xf32>
      %c21 = arith.constant 21 : index
      %62 = memref.load %arg3[%c21] : memref<98xf32, #tpu.memory_space<smem>>
      %c70 = arith.constant 70 : index
      %63 = memref.load %arg3[%c70] : memref<98xf32, #tpu.memory_space<smem>>
      %64 = vector.broadcast %62 : f32 to vector<1x256xf32>
      %65 = arith.mulf %64, %24 : vector<1x256xf32>
      %66 = vector.broadcast %63 : f32 to vector<1x256xf32>
      %67 = arith.mulf %66, %28 : vector<1x256xf32>
      %68 = arith.addf %65, %67 : vector<1x256xf32>
      %69 = arith.addf %61, %68 : vector<1x256xf32>
      %c28 = arith.constant 28 : index
      %70 = memref.load %arg3[%c28] : memref<98xf32, #tpu.memory_space<smem>>
      %c77 = arith.constant 77 : index
      %71 = memref.load %arg3[%c77] : memref<98xf32, #tpu.memory_space<smem>>
      %72 = vector.broadcast %70 : f32 to vector<1x256xf32>
      %73 = arith.mulf %72, %24 : vector<1x256xf32>
      %74 = vector.broadcast %71 : f32 to vector<1x256xf32>
      %75 = arith.mulf %74, %28 : vector<1x256xf32>
      %76 = arith.addf %73, %75 : vector<1x256xf32>
      %cst_22 = arith.constant 0.000000e+00 : f32
      %77 = vector.broadcast %cst_22 : f32 to vector<1x16xf32>
      %78 = vector.extract_strided_slice %76 {offsets = [0, 16], sizes = [1, 240], strides = [1, 1]} : vector<1x256xf32> to vector<1x240xf32>
      %79 = tpu.concatenate %78, %77 in 1 : vector<1x240xf32>, vector<1x16xf32> -> vector<1x256xf32>
      %80 = arith.addf %69, %79 : vector<1x256xf32>
      %c35 = arith.constant 35 : index
      %81 = memref.load %arg3[%c35] : memref<98xf32, #tpu.memory_space<smem>>
      %c84 = arith.constant 84 : index
      %82 = memref.load %arg3[%c84] : memref<98xf32, #tpu.memory_space<smem>>
      %83 = vector.broadcast %81 : f32 to vector<1x256xf32>
      %84 = arith.mulf %83, %24 : vector<1x256xf32>
      %85 = vector.broadcast %82 : f32 to vector<1x256xf32>
      %86 = arith.mulf %85, %28 : vector<1x256xf32>
      %87 = arith.addf %84, %86 : vector<1x256xf32>
      %cst_23 = arith.constant 0.000000e+00 : f32
      %88 = vector.broadcast %cst_23 : f32 to vector<1x32xf32>
      %89 = vector.extract_strided_slice %87 {offsets = [0, 32], sizes = [1, 224], strides = [1, 1]} : vector<1x256xf32> to vector<1x224xf32>
      %90 = tpu.concatenate %89, %88 in 1 : vector<1x224xf32>, vector<1x32xf32> -> vector<1x256xf32>
      %91 = arith.addf %80, %90 : vector<1x256xf32>
      %c42 = arith.constant 42 : index
      %92 = memref.load %arg3[%c42] : memref<98xf32, #tpu.memory_space<smem>>
      %c91 = arith.constant 91 : index
      %93 = memref.load %arg3[%c91] : memref<98xf32, #tpu.memory_space<smem>>
      %94 = vector.broadcast %92 : f32 to vector<1x256xf32>
      %95 = arith.mulf %94, %24 : vector<1x256xf32>
      %96 = vector.broadcast %93 : f32 to vector<1x256xf32>
      %97 = arith.mulf %96, %28 : vector<1x256xf32>
      %98 = arith.addf %95, %97 : vector<1x256xf32>
      %cst_24 = arith.constant 0.000000e+00 : f32
      %99 = vector.broadcast %cst_24 : f32 to vector<1x48xf32>
      %100 = vector.extract_strided_slice %98 {offsets = [0, 48], sizes = [1, 208], strides = [1, 1]} : vector<1x256xf32> to vector<1x208xf32>
      %101 = tpu.concatenate %100, %99 in 1 : vector<1x208xf32>, vector<1x48xf32> -> vector<1x256xf32>
      %102 = arith.addf %91, %101 : vector<1x256xf32>
      %c1 = arith.constant 1 : index
      %c0_25 = arith.constant 0 : index
      %103 = vector.load %arg4[%c1, %c0_25] : memref<7x256xf32, #tpu.memory_space<vmem>>, vector<1x256xf32>
      %cst_26 = arith.constant 0.000000e+00 : f32
      %104 = vector.broadcast %cst_26 : f32 to vector<1x2xf32>
      %105 = vector.extract_strided_slice %17 {offsets = [0, 0], sizes = [1, 254], strides = [1, 1]} : vector<1x256xf32> to vector<1x254xf32>
      %106 = tpu.concatenate %104, %105 in 1 : vector<1x2xf32>, vector<1x254xf32> -> vector<1x256xf32>
      %107 = arith.mulf %106, %103 : vector<1x256xf32>
      %cst_27 = arith.constant 0.000000e+00 : f32
      %108 = vector.broadcast %cst_27 : f32 to vector<1x2xf32>
      %109 = vector.extract_strided_slice %18 {offsets = [0, 0], sizes = [1, 254], strides = [1, 1]} : vector<1x256xf32> to vector<1x254xf32>
      %110 = tpu.concatenate %108, %109 in 1 : vector<1x2xf32>, vector<1x254xf32> -> vector<1x256xf32>
      %111 = arith.mulf %110, %103 : vector<1x256xf32>
      %c1_28 = arith.constant 1 : index
      %112 = memref.load %arg3[%c1_28] : memref<98xf32, #tpu.memory_space<smem>>
      %c50 = arith.constant 50 : index
      %113 = memref.load %arg3[%c50] : memref<98xf32, #tpu.memory_space<smem>>
      %114 = vector.broadcast %112 : f32 to vector<1x256xf32>
      %115 = arith.mulf %114, %107 : vector<1x256xf32>
      %116 = vector.broadcast %113 : f32 to vector<1x256xf32>
      %117 = arith.mulf %116, %111 : vector<1x256xf32>
      %118 = arith.addf %115, %117 : vector<1x256xf32>
      %cst_29 = arith.constant 0.000000e+00 : f32
      %119 = vector.broadcast %cst_29 : f32 to vector<1x48xf32>
      %120 = vector.extract_strided_slice %118 {offsets = [0, 0], sizes = [1, 208], strides = [1, 1]} : vector<1x256xf32> to vector<1x208xf32>
      %121 = tpu.concatenate %119, %120 in 1 : vector<1x48xf32>, vector<1x208xf32> -> vector<1x256xf32>
      %122 = arith.addf %102, %121 : vector<1x256xf32>
      %c8 = arith.constant 8 : index
      %123 = memref.load %arg3[%c8] : memref<98xf32, #tpu.memory_space<smem>>
      %c57 = arith.constant 57 : index
      %124 = memref.load %arg3[%c57] : memref<98xf32, #tpu.memory_space<smem>>
      %125 = vector.broadcast %123 : f32 to vector<1x256xf32>
      %126 = arith.mulf %125, %107 : vector<1x256xf32>
      %127 = vector.broadcast %124 : f32 to vector<1x256xf32>
      %128 = arith.mulf %127, %111 : vector<1x256xf32>
      %129 = arith.addf %126, %128 : vector<1x256xf32>
      %cst_30 = arith.constant 0.000000e+00 : f32
      %130 = vector.broadcast %cst_30 : f32 to vector<1x32xf32>
      %131 = vector.extract_strided_slice %129 {offsets = [0, 0], sizes = [1, 224], strides = [1, 1]} : vector<1x256xf32> to vector<1x224xf32>
      %132 = tpu.concatenate %130, %131 in 1 : vector<1x32xf32>, vector<1x224xf32> -> vector<1x256xf32>
      %133 = arith.addf %122, %132 : vector<1x256xf32>
      %c15 = arith.constant 15 : index
      %134 = memref.load %arg3[%c15] : memref<98xf32, #tpu.memory_space<smem>>
      %c64 = arith.constant 64 : index
      %135 = memref.load %arg3[%c64] : memref<98xf32, #tpu.memory_space<smem>>
      %136 = vector.broadcast %134 : f32 to vector<1x256xf32>
      %137 = arith.mulf %136, %107 : vector<1x256xf32>
      %138 = vector.broadcast %135 : f32 to vector<1x256xf32>
      %139 = arith.mulf %138, %111 : vector<1x256xf32>
      %140 = arith.addf %137, %139 : vector<1x256xf32>
      %cst_31 = arith.constant 0.000000e+00 : f32
      %141 = vector.broadcast %cst_31 : f32 to vector<1x16xf32>
      %142 = vector.extract_strided_slice %140 {offsets = [0, 0], sizes = [1, 240], strides = [1, 1]} : vector<1x256xf32> to vector<1x240xf32>
      %143 = tpu.concatenate %141, %142 in 1 : vector<1x16xf32>, vector<1x240xf32> -> vector<1x256xf32>
      %144 = arith.addf %133, %143 : vector<1x256xf32>
      %c22 = arith.constant 22 : index
      %145 = memref.load %arg3[%c22] : memref<98xf32, #tpu.memory_space<smem>>
      %c71 = arith.constant 71 : index
      %146 = memref.load %arg3[%c71] : memref<98xf32, #tpu.memory_space<smem>>
      %147 = vector.broadcast %145 : f32 to vector<1x256xf32>
      %148 = arith.mulf %147, %107 : vector<1x256xf32>
      %149 = vector.broadcast %146 : f32 to vector<1x256xf32>
      %150 = arith.mulf %149, %111 : vector<1x256xf32>
      %151 = arith.addf %148, %150 : vector<1x256xf32>
      %152 = arith.addf %144, %151 : vector<1x256xf32>
      %c29 = arith.constant 29 : index
      %153 = memref.load %arg3[%c29] : memref<98xf32, #tpu.memory_space<smem>>
      %c78 = arith.constant 78 : index
      %154 = memref.load %arg3[%c78] : memref<98xf32, #tpu.memory_space<smem>>
      %155 = vector.broadcast %153 : f32 to vector<1x256xf32>
      %156 = arith.mulf %155, %107 : vector<1x256xf32>
      %157 = vector.broadcast %154 : f32 to vector<1x256xf32>
      %158 = arith.mulf %157, %111 : vector<1x256xf32>
      %159 = arith.addf %156, %158 : vector<1x256xf32>
      %cst_32 = arith.constant 0.000000e+00 : f32
      %160 = vector.broadcast %cst_32 : f32 to vector<1x16xf32>
      %161 = vector.extract_strided_slice %159 {offsets = [0, 16], sizes = [1, 240], strides = [1, 1]} : vector<1x256xf32> to vector<1x240xf32>
      %162 = tpu.concatenate %161, %160 in 1 : vector<1x240xf32>, vector<1x16xf32> -> vector<1x256xf32>
      %163 = arith.addf %152, %162 : vector<1x256xf32>
      %c36 = arith.constant 36 : index
      %164 = memref.load %arg3[%c36] : memref<98xf32, #tpu.memory_space<smem>>
      %c85 = arith.constant 85 : index
      %165 = memref.load %arg3[%c85] : memref<98xf32, #tpu.memory_space<smem>>
      %166 = vector.broadcast %164 : f32 to vector<1x256xf32>
      %167 = arith.mulf %166, %107 : vector<1x256xf32>
      %168 = vector.broadcast %165 : f32 to vector<1x256xf32>
      %169 = arith.mulf %168, %111 : vector<1x256xf32>
      %170 = arith.addf %167, %169 : vector<1x256xf32>
      %cst_33 = arith.constant 0.000000e+00 : f32
      %171 = vector.broadcast %cst_33 : f32 to vector<1x32xf32>
      %172 = vector.extract_strided_slice %170 {offsets = [0, 32], sizes = [1, 224], strides = [1, 1]} : vector<1x256xf32> to vector<1x224xf32>
      %173 = tpu.concatenate %172, %171 in 1 : vector<1x224xf32>, vector<1x32xf32> -> vector<1x256xf32>
      %174 = arith.addf %163, %173 : vector<1x256xf32>
      %c43 = arith.constant 43 : index
      %175 = memref.load %arg3[%c43] : memref<98xf32, #tpu.memory_space<smem>>
      %c92 = arith.constant 92 : index
      %176 = memref.load %arg3[%c92] : memref<98xf32, #tpu.memory_space<smem>>
      %177 = vector.broadcast %175 : f32 to vector<1x256xf32>
      %178 = arith.mulf %177, %107 : vector<1x256xf32>
      %179 = vector.broadcast %176 : f32 to vector<1x256xf32>
      %180 = arith.mulf %179, %111 : vector<1x256xf32>
      %181 = arith.addf %178, %180 : vector<1x256xf32>
      %cst_34 = arith.constant 0.000000e+00 : f32
      %182 = vector.broadcast %cst_34 : f32 to vector<1x48xf32>
      %183 = vector.extract_strided_slice %181 {offsets = [0, 48], sizes = [1, 208], strides = [1, 1]} : vector<1x256xf32> to vector<1x208xf32>
      %184 = tpu.concatenate %183, %182 in 1 : vector<1x208xf32>, vector<1x48xf32> -> vector<1x256xf32>
      %185 = arith.addf %174, %184 : vector<1x256xf32>
      %c2 = arith.constant 2 : index
      %c0_35 = arith.constant 0 : index
      %186 = vector.load %arg4[%c2, %c0_35] : memref<7x256xf32, #tpu.memory_space<vmem>>, vector<1x256xf32>
      %cst_36 = arith.constant 0.000000e+00 : f32
      %187 = vector.broadcast %cst_36 : f32 to vector<1x1xf32>
      %188 = vector.extract_strided_slice %17 {offsets = [0, 0], sizes = [1, 255], strides = [1, 1]} : vector<1x256xf32> to vector<1x255xf32>
      %189 = tpu.concatenate %187, %188 in 1 : vector<1x1xf32>, vector<1x255xf32> -> vector<1x256xf32>
      %190 = arith.mulf %189, %186 : vector<1x256xf32>
      %cst_37 = arith.constant 0.000000e+00 : f32
      %191 = vector.broadcast %cst_37 : f32 to vector<1x1xf32>
      %192 = vector.extract_strided_slice %18 {offsets = [0, 0], sizes = [1, 255], strides = [1, 1]} : vector<1x256xf32> to vector<1x255xf32>
      %193 = tpu.concatenate %191, %192 in 1 : vector<1x1xf32>, vector<1x255xf32> -> vector<1x256xf32>
      %194 = arith.mulf %193, %186 : vector<1x256xf32>
      %c2_38 = arith.constant 2 : index
      %195 = memref.load %arg3[%c2_38] : memref<98xf32, #tpu.memory_space<smem>>
      %c51 = arith.constant 51 : index
      %196 = memref.load %arg3[%c51] : memref<98xf32, #tpu.memory_space<smem>>
      %197 = vector.broadcast %195 : f32 to vector<1x256xf32>
      %198 = arith.mulf %197, %190 : vector<1x256xf32>
      %199 = vector.broadcast %196 : f32 to vector<1x256xf32>
      %200 = arith.mulf %199, %194 : vector<1x256xf32>
      %201 = arith.addf %198, %200 : vector<1x256xf32>
      %cst_39 = arith.constant 0.000000e+00 : f32
      %202 = vector.broadcast %cst_39 : f32 to vector<1x48xf32>
      %203 = vector.extract_strided_slice %201 {offsets = [0, 0], sizes = [1, 208], strides = [1, 1]} : vector<1x256xf32> to vector<1x208xf32>
      %204 = tpu.concatenate %202, %203 in 1 : vector<1x48xf32>, vector<1x208xf32> -> vector<1x256xf32>
      %205 = arith.addf %185, %204 : vector<1x256xf32>
      %c9 = arith.constant 9 : index
      %206 = memref.load %arg3[%c9] : memref<98xf32, #tpu.memory_space<smem>>
      %c58 = arith.constant 58 : index
      %207 = memref.load %arg3[%c58] : memref<98xf32, #tpu.memory_space<smem>>
      %208 = vector.broadcast %206 : f32 to vector<1x256xf32>
      %209 = arith.mulf %208, %190 : vector<1x256xf32>
      %210 = vector.broadcast %207 : f32 to vector<1x256xf32>
      %211 = arith.mulf %210, %194 : vector<1x256xf32>
      %212 = arith.addf %209, %211 : vector<1x256xf32>
      %cst_40 = arith.constant 0.000000e+00 : f32
      %213 = vector.broadcast %cst_40 : f32 to vector<1x32xf32>
      %214 = vector.extract_strided_slice %212 {offsets = [0, 0], sizes = [1, 224], strides = [1, 1]} : vector<1x256xf32> to vector<1x224xf32>
      %215 = tpu.concatenate %213, %214 in 1 : vector<1x32xf32>, vector<1x224xf32> -> vector<1x256xf32>
      %216 = arith.addf %205, %215 : vector<1x256xf32>
      %c16 = arith.constant 16 : index
      %217 = memref.load %arg3[%c16] : memref<98xf32, #tpu.memory_space<smem>>
      %c65 = arith.constant 65 : index
      %218 = memref.load %arg3[%c65] : memref<98xf32, #tpu.memory_space<smem>>
      %219 = vector.broadcast %217 : f32 to vector<1x256xf32>
      %220 = arith.mulf %219, %190 : vector<1x256xf32>
      %221 = vector.broadcast %218 : f32 to vector<1x256xf32>
      %222 = arith.mulf %221, %194 : vector<1x256xf32>
      %223 = arith.addf %220, %222 : vector<1x256xf32>
      %cst_41 = arith.constant 0.000000e+00 : f32
      %224 = vector.broadcast %cst_41 : f32 to vector<1x16xf32>
      %225 = vector.extract_strided_slice %223 {offsets = [0, 0], sizes = [1, 240], strides = [1, 1]} : vector<1x256xf32> to vector<1x240xf32>
      %226 = tpu.concatenate %224, %225 in 1 : vector<1x16xf32>, vector<1x240xf32> -> vector<1x256xf32>
      %227 = arith.addf %216, %226 : vector<1x256xf32>
      %c23 = arith.constant 23 : index
      %228 = memref.load %arg3[%c23] : memref<98xf32, #tpu.memory_space<smem>>
      %c72 = arith.constant 72 : index
      %229 = memref.load %arg3[%c72] : memref<98xf32, #tpu.memory_space<smem>>
      %230 = vector.broadcast %228 : f32 to vector<1x256xf32>
      %231 = arith.mulf %230, %190 : vector<1x256xf32>
      %232 = vector.broadcast %229 : f32 to vector<1x256xf32>
      %233 = arith.mulf %232, %194 : vector<1x256xf32>
      %234 = arith.addf %231, %233 : vector<1x256xf32>
      %235 = arith.addf %227, %234 : vector<1x256xf32>
      %c30 = arith.constant 30 : index
      %236 = memref.load %arg3[%c30] : memref<98xf32, #tpu.memory_space<smem>>
      %c79 = arith.constant 79 : index
      %237 = memref.load %arg3[%c79] : memref<98xf32, #tpu.memory_space<smem>>
      %238 = vector.broadcast %236 : f32 to vector<1x256xf32>
      %239 = arith.mulf %238, %190 : vector<1x256xf32>
      %240 = vector.broadcast %237 : f32 to vector<1x256xf32>
      %241 = arith.mulf %240, %194 : vector<1x256xf32>
      %242 = arith.addf %239, %241 : vector<1x256xf32>
      %cst_42 = arith.constant 0.000000e+00 : f32
      %243 = vector.broadcast %cst_42 : f32 to vector<1x16xf32>
      %244 = vector.extract_strided_slice %242 {offsets = [0, 16], sizes = [1, 240], strides = [1, 1]} : vector<1x256xf32> to vector<1x240xf32>
      %245 = tpu.concatenate %244, %243 in 1 : vector<1x240xf32>, vector<1x16xf32> -> vector<1x256xf32>
      %246 = arith.addf %235, %245 : vector<1x256xf32>
      %c37 = arith.constant 37 : index
      %247 = memref.load %arg3[%c37] : memref<98xf32, #tpu.memory_space<smem>>
      %c86 = arith.constant 86 : index
      %248 = memref.load %arg3[%c86] : memref<98xf32, #tpu.memory_space<smem>>
      %249 = vector.broadcast %247 : f32 to vector<1x256xf32>
      %250 = arith.mulf %249, %190 : vector<1x256xf32>
      %251 = vector.broadcast %248 : f32 to vector<1x256xf32>
      %252 = arith.mulf %251, %194 : vector<1x256xf32>
      %253 = arith.addf %250, %252 : vector<1x256xf32>
      %cst_43 = arith.constant 0.000000e+00 : f32
      %254 = vector.broadcast %cst_43 : f32 to vector<1x32xf32>
      %255 = vector.extract_strided_slice %253 {offsets = [0, 32], sizes = [1, 224], strides = [1, 1]} : vector<1x256xf32> to vector<1x224xf32>
      %256 = tpu.concatenate %255, %254 in 1 : vector<1x224xf32>, vector<1x32xf32> -> vector<1x256xf32>
      %257 = arith.addf %246, %256 : vector<1x256xf32>
      %c44 = arith.constant 44 : index
      %258 = memref.load %arg3[%c44] : memref<98xf32, #tpu.memory_space<smem>>
      %c93 = arith.constant 93 : index
      %259 = memref.load %arg3[%c93] : memref<98xf32, #tpu.memory_space<smem>>
      %260 = vector.broadcast %258 : f32 to vector<1x256xf32>
      %261 = arith.mulf %260, %190 : vector<1x256xf32>
      %262 = vector.broadcast %259 : f32 to vector<1x256xf32>
      %263 = arith.mulf %262, %194 : vector<1x256xf32>
      %264 = arith.addf %261, %263 : vector<1x256xf32>
      %cst_44 = arith.constant 0.000000e+00 : f32
      %265 = vector.broadcast %cst_44 : f32 to vector<1x48xf32>
      %266 = vector.extract_strided_slice %264 {offsets = [0, 48], sizes = [1, 208], strides = [1, 1]} : vector<1x256xf32> to vector<1x208xf32>
      %267 = tpu.concatenate %266, %265 in 1 : vector<1x208xf32>, vector<1x48xf32> -> vector<1x256xf32>
      %268 = arith.addf %257, %267 : vector<1x256xf32>
      %c3 = arith.constant 3 : index
      %269 = memref.load %arg3[%c3] : memref<98xf32, #tpu.memory_space<smem>>
      %c52 = arith.constant 52 : index
      %270 = memref.load %arg3[%c52] : memref<98xf32, #tpu.memory_space<smem>>
      %271 = vector.broadcast %269 : f32 to vector<1x256xf32>
      %272 = arith.mulf %271, %17 : vector<1x256xf32>
      %273 = vector.broadcast %270 : f32 to vector<1x256xf32>
      %274 = arith.mulf %273, %18 : vector<1x256xf32>
      %275 = arith.addf %272, %274 : vector<1x256xf32>
      %cst_45 = arith.constant 0.000000e+00 : f32
      %276 = vector.broadcast %cst_45 : f32 to vector<1x48xf32>
      %277 = vector.extract_strided_slice %275 {offsets = [0, 0], sizes = [1, 208], strides = [1, 1]} : vector<1x256xf32> to vector<1x208xf32>
      %278 = tpu.concatenate %276, %277 in 1 : vector<1x48xf32>, vector<1x208xf32> -> vector<1x256xf32>
      %279 = arith.addf %268, %278 : vector<1x256xf32>
      %c10 = arith.constant 10 : index
      %280 = memref.load %arg3[%c10] : memref<98xf32, #tpu.memory_space<smem>>
      %c59 = arith.constant 59 : index
      %281 = memref.load %arg3[%c59] : memref<98xf32, #tpu.memory_space<smem>>
      %282 = vector.broadcast %280 : f32 to vector<1x256xf32>
      %283 = arith.mulf %282, %17 : vector<1x256xf32>
      %284 = vector.broadcast %281 : f32 to vector<1x256xf32>
      %285 = arith.mulf %284, %18 : vector<1x256xf32>
      %286 = arith.addf %283, %285 : vector<1x256xf32>
      %cst_46 = arith.constant 0.000000e+00 : f32
      %287 = vector.broadcast %cst_46 : f32 to vector<1x32xf32>
      %288 = vector.extract_strided_slice %286 {offsets = [0, 0], sizes = [1, 224], strides = [1, 1]} : vector<1x256xf32> to vector<1x224xf32>
      %289 = tpu.concatenate %287, %288 in 1 : vector<1x32xf32>, vector<1x224xf32> -> vector<1x256xf32>
      %290 = arith.addf %279, %289 : vector<1x256xf32>
      %c17 = arith.constant 17 : index
      %291 = memref.load %arg3[%c17] : memref<98xf32, #tpu.memory_space<smem>>
      %c66 = arith.constant 66 : index
      %292 = memref.load %arg3[%c66] : memref<98xf32, #tpu.memory_space<smem>>
      %293 = vector.broadcast %291 : f32 to vector<1x256xf32>
      %294 = arith.mulf %293, %17 : vector<1x256xf32>
      %295 = vector.broadcast %292 : f32 to vector<1x256xf32>
      %296 = arith.mulf %295, %18 : vector<1x256xf32>
      %297 = arith.addf %294, %296 : vector<1x256xf32>
      %cst_47 = arith.constant 0.000000e+00 : f32
      %298 = vector.broadcast %cst_47 : f32 to vector<1x16xf32>
      %299 = vector.extract_strided_slice %297 {offsets = [0, 0], sizes = [1, 240], strides = [1, 1]} : vector<1x256xf32> to vector<1x240xf32>
      %300 = tpu.concatenate %298, %299 in 1 : vector<1x16xf32>, vector<1x240xf32> -> vector<1x256xf32>
      %301 = arith.addf %290, %300 : vector<1x256xf32>
      %c24 = arith.constant 24 : index
      %302 = memref.load %arg3[%c24] : memref<98xf32, #tpu.memory_space<smem>>
      %c73 = arith.constant 73 : index
      %303 = memref.load %arg3[%c73] : memref<98xf32, #tpu.memory_space<smem>>
      %304 = vector.broadcast %302 : f32 to vector<1x256xf32>
      %305 = arith.mulf %304, %17 : vector<1x256xf32>
      %306 = vector.broadcast %303 : f32 to vector<1x256xf32>
      %307 = arith.mulf %306, %18 : vector<1x256xf32>
      %308 = arith.addf %305, %307 : vector<1x256xf32>
      %309 = arith.addf %301, %308 : vector<1x256xf32>
      %c31 = arith.constant 31 : index
      %310 = memref.load %arg3[%c31] : memref<98xf32, #tpu.memory_space<smem>>
      %c80 = arith.constant 80 : index
      %311 = memref.load %arg3[%c80] : memref<98xf32, #tpu.memory_space<smem>>
      %312 = vector.broadcast %310 : f32 to vector<1x256xf32>
      %313 = arith.mulf %312, %17 : vector<1x256xf32>
      %314 = vector.broadcast %311 : f32 to vector<1x256xf32>
      %315 = arith.mulf %314, %18 : vector<1x256xf32>
      %316 = arith.addf %313, %315 : vector<1x256xf32>
      %cst_48 = arith.constant 0.000000e+00 : f32
      %317 = vector.broadcast %cst_48 : f32 to vector<1x16xf32>
      %318 = vector.extract_strided_slice %316 {offsets = [0, 16], sizes = [1, 240], strides = [1, 1]} : vector<1x256xf32> to vector<1x240xf32>
      %319 = tpu.concatenate %318, %317 in 1 : vector<1x240xf32>, vector<1x16xf32> -> vector<1x256xf32>
      %320 = arith.addf %309, %319 : vector<1x256xf32>
      %c38 = arith.constant 38 : index
      %321 = memref.load %arg3[%c38] : memref<98xf32, #tpu.memory_space<smem>>
      %c87 = arith.constant 87 : index
      %322 = memref.load %arg3[%c87] : memref<98xf32, #tpu.memory_space<smem>>
      %323 = vector.broadcast %321 : f32 to vector<1x256xf32>
      %324 = arith.mulf %323, %17 : vector<1x256xf32>
      %325 = vector.broadcast %322 : f32 to vector<1x256xf32>
      %326 = arith.mulf %325, %18 : vector<1x256xf32>
      %327 = arith.addf %324, %326 : vector<1x256xf32>
      %cst_49 = arith.constant 0.000000e+00 : f32
      %328 = vector.broadcast %cst_49 : f32 to vector<1x32xf32>
      %329 = vector.extract_strided_slice %327 {offsets = [0, 32], sizes = [1, 224], strides = [1, 1]} : vector<1x256xf32> to vector<1x224xf32>
      %330 = tpu.concatenate %329, %328 in 1 : vector<1x224xf32>, vector<1x32xf32> -> vector<1x256xf32>
      %331 = arith.addf %320, %330 : vector<1x256xf32>
      %c45 = arith.constant 45 : index
      %332 = memref.load %arg3[%c45] : memref<98xf32, #tpu.memory_space<smem>>
      %c94 = arith.constant 94 : index
      %333 = memref.load %arg3[%c94] : memref<98xf32, #tpu.memory_space<smem>>
      %334 = vector.broadcast %332 : f32 to vector<1x256xf32>
      %335 = arith.mulf %334, %17 : vector<1x256xf32>
      %336 = vector.broadcast %333 : f32 to vector<1x256xf32>
      %337 = arith.mulf %336, %18 : vector<1x256xf32>
      %338 = arith.addf %335, %337 : vector<1x256xf32>
      %cst_50 = arith.constant 0.000000e+00 : f32
      %339 = vector.broadcast %cst_50 : f32 to vector<1x48xf32>
      %340 = vector.extract_strided_slice %338 {offsets = [0, 48], sizes = [1, 208], strides = [1, 1]} : vector<1x256xf32> to vector<1x208xf32>
      %341 = tpu.concatenate %340, %339 in 1 : vector<1x208xf32>, vector<1x48xf32> -> vector<1x256xf32>
      %342 = arith.addf %331, %341 : vector<1x256xf32>
      %c4 = arith.constant 4 : index
      %c0_51 = arith.constant 0 : index
      %343 = vector.load %arg4[%c4, %c0_51] : memref<7x256xf32, #tpu.memory_space<vmem>>, vector<1x256xf32>
      %cst_52 = arith.constant 0.000000e+00 : f32
      %344 = vector.broadcast %cst_52 : f32 to vector<1x1xf32>
      %345 = vector.extract_strided_slice %17 {offsets = [0, 1], sizes = [1, 255], strides = [1, 1]} : vector<1x256xf32> to vector<1x255xf32>
      %346 = tpu.concatenate %345, %344 in 1 : vector<1x255xf32>, vector<1x1xf32> -> vector<1x256xf32>
      %347 = arith.mulf %346, %343 : vector<1x256xf32>
      %cst_53 = arith.constant 0.000000e+00 : f32
      %348 = vector.broadcast %cst_53 : f32 to vector<1x1xf32>
      %349 = vector.extract_strided_slice %18 {offsets = [0, 1], sizes = [1, 255], strides = [1, 1]} : vector<1x256xf32> to vector<1x255xf32>
      %350 = tpu.concatenate %349, %348 in 1 : vector<1x255xf32>, vector<1x1xf32> -> vector<1x256xf32>
      %351 = arith.mulf %350, %343 : vector<1x256xf32>
      %c4_54 = arith.constant 4 : index
      %352 = memref.load %arg3[%c4_54] : memref<98xf32, #tpu.memory_space<smem>>
      %c53 = arith.constant 53 : index
      %353 = memref.load %arg3[%c53] : memref<98xf32, #tpu.memory_space<smem>>
      %354 = vector.broadcast %352 : f32 to vector<1x256xf32>
      %355 = arith.mulf %354, %347 : vector<1x256xf32>
      %356 = vector.broadcast %353 : f32 to vector<1x256xf32>
      %357 = arith.mulf %356, %351 : vector<1x256xf32>
      %358 = arith.addf %355, %357 : vector<1x256xf32>
      %cst_55 = arith.constant 0.000000e+00 : f32
      %359 = vector.broadcast %cst_55 : f32 to vector<1x48xf32>
      %360 = vector.extract_strided_slice %358 {offsets = [0, 0], sizes = [1, 208], strides = [1, 1]} : vector<1x256xf32> to vector<1x208xf32>
      %361 = tpu.concatenate %359, %360 in 1 : vector<1x48xf32>, vector<1x208xf32> -> vector<1x256xf32>
      %362 = arith.addf %342, %361 : vector<1x256xf32>
      %c11 = arith.constant 11 : index
      %363 = memref.load %arg3[%c11] : memref<98xf32, #tpu.memory_space<smem>>
      %c60 = arith.constant 60 : index
      %364 = memref.load %arg3[%c60] : memref<98xf32, #tpu.memory_space<smem>>
      %365 = vector.broadcast %363 : f32 to vector<1x256xf32>
      %366 = arith.mulf %365, %347 : vector<1x256xf32>
      %367 = vector.broadcast %364 : f32 to vector<1x256xf32>
      %368 = arith.mulf %367, %351 : vector<1x256xf32>
      %369 = arith.addf %366, %368 : vector<1x256xf32>
      %cst_56 = arith.constant 0.000000e+00 : f32
      %370 = vector.broadcast %cst_56 : f32 to vector<1x32xf32>
      %371 = vector.extract_strided_slice %369 {offsets = [0, 0], sizes = [1, 224], strides = [1, 1]} : vector<1x256xf32> to vector<1x224xf32>
      %372 = tpu.concatenate %370, %371 in 1 : vector<1x32xf32>, vector<1x224xf32> -> vector<1x256xf32>
      %373 = arith.addf %362, %372 : vector<1x256xf32>
      %c18 = arith.constant 18 : index
      %374 = memref.load %arg3[%c18] : memref<98xf32, #tpu.memory_space<smem>>
      %c67 = arith.constant 67 : index
      %375 = memref.load %arg3[%c67] : memref<98xf32, #tpu.memory_space<smem>>
      %376 = vector.broadcast %374 : f32 to vector<1x256xf32>
      %377 = arith.mulf %376, %347 : vector<1x256xf32>
      %378 = vector.broadcast %375 : f32 to vector<1x256xf32>
      %379 = arith.mulf %378, %351 : vector<1x256xf32>
      %380 = arith.addf %377, %379 : vector<1x256xf32>
      %cst_57 = arith.constant 0.000000e+00 : f32
      %381 = vector.broadcast %cst_57 : f32 to vector<1x16xf32>
      %382 = vector.extract_strided_slice %380 {offsets = [0, 0], sizes = [1, 240], strides = [1, 1]} : vector<1x256xf32> to vector<1x240xf32>
      %383 = tpu.concatenate %381, %382 in 1 : vector<1x16xf32>, vector<1x240xf32> -> vector<1x256xf32>
      %384 = arith.addf %373, %383 : vector<1x256xf32>
      %c25 = arith.constant 25 : index
      %385 = memref.load %arg3[%c25] : memref<98xf32, #tpu.memory_space<smem>>
      %c74 = arith.constant 74 : index
      %386 = memref.load %arg3[%c74] : memref<98xf32, #tpu.memory_space<smem>>
      %387 = vector.broadcast %385 : f32 to vector<1x256xf32>
      %388 = arith.mulf %387, %347 : vector<1x256xf32>
      %389 = vector.broadcast %386 : f32 to vector<1x256xf32>
      %390 = arith.mulf %389, %351 : vector<1x256xf32>
      %391 = arith.addf %388, %390 : vector<1x256xf32>
      %392 = arith.addf %384, %391 : vector<1x256xf32>
      %c32 = arith.constant 32 : index
      %393 = memref.load %arg3[%c32] : memref<98xf32, #tpu.memory_space<smem>>
      %c81 = arith.constant 81 : index
      %394 = memref.load %arg3[%c81] : memref<98xf32, #tpu.memory_space<smem>>
      %395 = vector.broadcast %393 : f32 to vector<1x256xf32>
      %396 = arith.mulf %395, %347 : vector<1x256xf32>
      %397 = vector.broadcast %394 : f32 to vector<1x256xf32>
      %398 = arith.mulf %397, %351 : vector<1x256xf32>
      %399 = arith.addf %396, %398 : vector<1x256xf32>
      %cst_58 = arith.constant 0.000000e+00 : f32
      %400 = vector.broadcast %cst_58 : f32 to vector<1x16xf32>
      %401 = vector.extract_strided_slice %399 {offsets = [0, 16], sizes = [1, 240], strides = [1, 1]} : vector<1x256xf32> to vector<1x240xf32>
      %402 = tpu.concatenate %401, %400 in 1 : vector<1x240xf32>, vector<1x16xf32> -> vector<1x256xf32>
      %403 = arith.addf %392, %402 : vector<1x256xf32>
      %c39 = arith.constant 39 : index
      %404 = memref.load %arg3[%c39] : memref<98xf32, #tpu.memory_space<smem>>
      %c88 = arith.constant 88 : index
      %405 = memref.load %arg3[%c88] : memref<98xf32, #tpu.memory_space<smem>>
      %406 = vector.broadcast %404 : f32 to vector<1x256xf32>
      %407 = arith.mulf %406, %347 : vector<1x256xf32>
      %408 = vector.broadcast %405 : f32 to vector<1x256xf32>
      %409 = arith.mulf %408, %351 : vector<1x256xf32>
      %410 = arith.addf %407, %409 : vector<1x256xf32>
      %cst_59 = arith.constant 0.000000e+00 : f32
      %411 = vector.broadcast %cst_59 : f32 to vector<1x32xf32>
      %412 = vector.extract_strided_slice %410 {offsets = [0, 32], sizes = [1, 224], strides = [1, 1]} : vector<1x256xf32> to vector<1x224xf32>
      %413 = tpu.concatenate %412, %411 in 1 : vector<1x224xf32>, vector<1x32xf32> -> vector<1x256xf32>
      %414 = arith.addf %403, %413 : vector<1x256xf32>
      %c46 = arith.constant 46 : index
      %415 = memref.load %arg3[%c46] : memref<98xf32, #tpu.memory_space<smem>>
      %c95 = arith.constant 95 : index
      %416 = memref.load %arg3[%c95] : memref<98xf32, #tpu.memory_space<smem>>
      %417 = vector.broadcast %415 : f32 to vector<1x256xf32>
      %418 = arith.mulf %417, %347 : vector<1x256xf32>
      %419 = vector.broadcast %416 : f32 to vector<1x256xf32>
      %420 = arith.mulf %419, %351 : vector<1x256xf32>
      %421 = arith.addf %418, %420 : vector<1x256xf32>
      %cst_60 = arith.constant 0.000000e+00 : f32
      %422 = vector.broadcast %cst_60 : f32 to vector<1x48xf32>
      %423 = vector.extract_strided_slice %421 {offsets = [0, 48], sizes = [1, 208], strides = [1, 1]} : vector<1x256xf32> to vector<1x208xf32>
      %424 = tpu.concatenate %423, %422 in 1 : vector<1x208xf32>, vector<1x48xf32> -> vector<1x256xf32>
      %425 = arith.addf %414, %424 : vector<1x256xf32>
      %c5 = arith.constant 5 : index
      %c0_61 = arith.constant 0 : index
      %426 = vector.load %arg4[%c5, %c0_61] : memref<7x256xf32, #tpu.memory_space<vmem>>, vector<1x256xf32>
      %cst_62 = arith.constant 0.000000e+00 : f32
      %427 = vector.broadcast %cst_62 : f32 to vector<1x2xf32>
      %428 = vector.extract_strided_slice %17 {offsets = [0, 2], sizes = [1, 254], strides = [1, 1]} : vector<1x256xf32> to vector<1x254xf32>
      %429 = tpu.concatenate %428, %427 in 1 : vector<1x254xf32>, vector<1x2xf32> -> vector<1x256xf32>
      %430 = arith.mulf %429, %426 : vector<1x256xf32>
      %cst_63 = arith.constant 0.000000e+00 : f32
      %431 = vector.broadcast %cst_63 : f32 to vector<1x2xf32>
      %432 = vector.extract_strided_slice %18 {offsets = [0, 2], sizes = [1, 254], strides = [1, 1]} : vector<1x256xf32> to vector<1x254xf32>
      %433 = tpu.concatenate %432, %431 in 1 : vector<1x254xf32>, vector<1x2xf32> -> vector<1x256xf32>
      %434 = arith.mulf %433, %426 : vector<1x256xf32>
      %c5_64 = arith.constant 5 : index
      %435 = memref.load %arg3[%c5_64] : memref<98xf32, #tpu.memory_space<smem>>
      %c54 = arith.constant 54 : index
      %436 = memref.load %arg3[%c54] : memref<98xf32, #tpu.memory_space<smem>>
      %437 = vector.broadcast %435 : f32 to vector<1x256xf32>
      %438 = arith.mulf %437, %430 : vector<1x256xf32>
      %439 = vector.broadcast %436 : f32 to vector<1x256xf32>
      %440 = arith.mulf %439, %434 : vector<1x256xf32>
      %441 = arith.addf %438, %440 : vector<1x256xf32>
      %cst_65 = arith.constant 0.000000e+00 : f32
      %442 = vector.broadcast %cst_65 : f32 to vector<1x48xf32>
      %443 = vector.extract_strided_slice %441 {offsets = [0, 0], sizes = [1, 208], strides = [1, 1]} : vector<1x256xf32> to vector<1x208xf32>
      %444 = tpu.concatenate %442, %443 in 1 : vector<1x48xf32>, vector<1x208xf32> -> vector<1x256xf32>
      %445 = arith.addf %425, %444 : vector<1x256xf32>
      %c12 = arith.constant 12 : index
      %446 = memref.load %arg3[%c12] : memref<98xf32, #tpu.memory_space<smem>>
      %c61 = arith.constant 61 : index
      %447 = memref.load %arg3[%c61] : memref<98xf32, #tpu.memory_space<smem>>
      %448 = vector.broadcast %446 : f32 to vector<1x256xf32>
      %449 = arith.mulf %448, %430 : vector<1x256xf32>
      %450 = vector.broadcast %447 : f32 to vector<1x256xf32>
      %451 = arith.mulf %450, %434 : vector<1x256xf32>
      %452 = arith.addf %449, %451 : vector<1x256xf32>
      %cst_66 = arith.constant 0.000000e+00 : f32
      %453 = vector.broadcast %cst_66 : f32 to vector<1x32xf32>
      %454 = vector.extract_strided_slice %452 {offsets = [0, 0], sizes = [1, 224], strides = [1, 1]} : vector<1x256xf32> to vector<1x224xf32>
      %455 = tpu.concatenate %453, %454 in 1 : vector<1x32xf32>, vector<1x224xf32> -> vector<1x256xf32>
      %456 = arith.addf %445, %455 : vector<1x256xf32>
      %c19 = arith.constant 19 : index
      %457 = memref.load %arg3[%c19] : memref<98xf32, #tpu.memory_space<smem>>
      %c68 = arith.constant 68 : index
      %458 = memref.load %arg3[%c68] : memref<98xf32, #tpu.memory_space<smem>>
      %459 = vector.broadcast %457 : f32 to vector<1x256xf32>
      %460 = arith.mulf %459, %430 : vector<1x256xf32>
      %461 = vector.broadcast %458 : f32 to vector<1x256xf32>
      %462 = arith.mulf %461, %434 : vector<1x256xf32>
      %463 = arith.addf %460, %462 : vector<1x256xf32>
      %cst_67 = arith.constant 0.000000e+00 : f32
      %464 = vector.broadcast %cst_67 : f32 to vector<1x16xf32>
      %465 = vector.extract_strided_slice %463 {offsets = [0, 0], sizes = [1, 240], strides = [1, 1]} : vector<1x256xf32> to vector<1x240xf32>
      %466 = tpu.concatenate %464, %465 in 1 : vector<1x16xf32>, vector<1x240xf32> -> vector<1x256xf32>
      %467 = arith.addf %456, %466 : vector<1x256xf32>
      %c26 = arith.constant 26 : index
      %468 = memref.load %arg3[%c26] : memref<98xf32, #tpu.memory_space<smem>>
      %c75 = arith.constant 75 : index
      %469 = memref.load %arg3[%c75] : memref<98xf32, #tpu.memory_space<smem>>
      %470 = vector.broadcast %468 : f32 to vector<1x256xf32>
      %471 = arith.mulf %470, %430 : vector<1x256xf32>
      %472 = vector.broadcast %469 : f32 to vector<1x256xf32>
      %473 = arith.mulf %472, %434 : vector<1x256xf32>
      %474 = arith.addf %471, %473 : vector<1x256xf32>
      %475 = arith.addf %467, %474 : vector<1x256xf32>
      %c33 = arith.constant 33 : index
      %476 = memref.load %arg3[%c33] : memref<98xf32, #tpu.memory_space<smem>>
      %c82 = arith.constant 82 : index
      %477 = memref.load %arg3[%c82] : memref<98xf32, #tpu.memory_space<smem>>
      %478 = vector.broadcast %476 : f32 to vector<1x256xf32>
      %479 = arith.mulf %478, %430 : vector<1x256xf32>
      %480 = vector.broadcast %477 : f32 to vector<1x256xf32>
      %481 = arith.mulf %480, %434 : vector<1x256xf32>
      %482 = arith.addf %479, %481 : vector<1x256xf32>
      %cst_68 = arith.constant 0.000000e+00 : f32
      %483 = vector.broadcast %cst_68 : f32 to vector<1x16xf32>
      %484 = vector.extract_strided_slice %482 {offsets = [0, 16], sizes = [1, 240], strides = [1, 1]} : vector<1x256xf32> to vector<1x240xf32>
      %485 = tpu.concatenate %484, %483 in 1 : vector<1x240xf32>, vector<1x16xf32> -> vector<1x256xf32>
      %486 = arith.addf %475, %485 : vector<1x256xf32>
      %c40 = arith.constant 40 : index
      %487 = memref.load %arg3[%c40] : memref<98xf32, #tpu.memory_space<smem>>
      %c89 = arith.constant 89 : index
      %488 = memref.load %arg3[%c89] : memref<98xf32, #tpu.memory_space<smem>>
      %489 = vector.broadcast %487 : f32 to vector<1x256xf32>
      %490 = arith.mulf %489, %430 : vector<1x256xf32>
      %491 = vector.broadcast %488 : f32 to vector<1x256xf32>
      %492 = arith.mulf %491, %434 : vector<1x256xf32>
      %493 = arith.addf %490, %492 : vector<1x256xf32>
      %cst_69 = arith.constant 0.000000e+00 : f32
      %494 = vector.broadcast %cst_69 : f32 to vector<1x32xf32>
      %495 = vector.extract_strided_slice %493 {offsets = [0, 32], sizes = [1, 224], strides = [1, 1]} : vector<1x256xf32> to vector<1x224xf32>
      %496 = tpu.concatenate %495, %494 in 1 : vector<1x224xf32>, vector<1x32xf32> -> vector<1x256xf32>
      %497 = arith.addf %486, %496 : vector<1x256xf32>
      %c47 = arith.constant 47 : index
      %498 = memref.load %arg3[%c47] : memref<98xf32, #tpu.memory_space<smem>>
      %c96 = arith.constant 96 : index
      %499 = memref.load %arg3[%c96] : memref<98xf32, #tpu.memory_space<smem>>
      %500 = vector.broadcast %498 : f32 to vector<1x256xf32>
      %501 = arith.mulf %500, %430 : vector<1x256xf32>
      %502 = vector.broadcast %499 : f32 to vector<1x256xf32>
      %503 = arith.mulf %502, %434 : vector<1x256xf32>
      %504 = arith.addf %501, %503 : vector<1x256xf32>
      %cst_70 = arith.constant 0.000000e+00 : f32
      %505 = vector.broadcast %cst_70 : f32 to vector<1x48xf32>
      %506 = vector.extract_strided_slice %504 {offsets = [0, 48], sizes = [1, 208], strides = [1, 1]} : vector<1x256xf32> to vector<1x208xf32>
      %507 = tpu.concatenate %506, %505 in 1 : vector<1x208xf32>, vector<1x48xf32> -> vector<1x256xf32>
      %508 = arith.addf %497, %507 : vector<1x256xf32>
      %c6 = arith.constant 6 : index
      %c0_71 = arith.constant 0 : index
      %509 = vector.load %arg4[%c6, %c0_71] : memref<7x256xf32, #tpu.memory_space<vmem>>, vector<1x256xf32>
      %cst_72 = arith.constant 0.000000e+00 : f32
      %510 = vector.broadcast %cst_72 : f32 to vector<1x3xf32>
      %511 = vector.extract_strided_slice %17 {offsets = [0, 3], sizes = [1, 253], strides = [1, 1]} : vector<1x256xf32> to vector<1x253xf32>
      %512 = tpu.concatenate %511, %510 in 1 : vector<1x253xf32>, vector<1x3xf32> -> vector<1x256xf32>
      %513 = arith.mulf %512, %509 : vector<1x256xf32>
      %cst_73 = arith.constant 0.000000e+00 : f32
      %514 = vector.broadcast %cst_73 : f32 to vector<1x3xf32>
      %515 = vector.extract_strided_slice %18 {offsets = [0, 3], sizes = [1, 253], strides = [1, 1]} : vector<1x256xf32> to vector<1x253xf32>
      %516 = tpu.concatenate %515, %514 in 1 : vector<1x253xf32>, vector<1x3xf32> -> vector<1x256xf32>
      %517 = arith.mulf %516, %509 : vector<1x256xf32>
      %c6_74 = arith.constant 6 : index
      %518 = memref.load %arg3[%c6_74] : memref<98xf32, #tpu.memory_space<smem>>
      %c55 = arith.constant 55 : index
      %519 = memref.load %arg3[%c55] : memref<98xf32, #tpu.memory_space<smem>>
      %520 = vector.broadcast %518 : f32 to vector<1x256xf32>
      %521 = arith.mulf %520, %513 : vector<1x256xf32>
      %522 = vector.broadcast %519 : f32 to vector<1x256xf32>
      %523 = arith.mulf %522, %517 : vector<1x256xf32>
      %524 = arith.addf %521, %523 : vector<1x256xf32>
      %cst_75 = arith.constant 0.000000e+00 : f32
      %525 = vector.broadcast %cst_75 : f32 to vector<1x48xf32>
      %526 = vector.extract_strided_slice %524 {offsets = [0, 0], sizes = [1, 208], strides = [1, 1]} : vector<1x256xf32> to vector<1x208xf32>
      %527 = tpu.concatenate %525, %526 in 1 : vector<1x48xf32>, vector<1x208xf32> -> vector<1x256xf32>
      %528 = arith.addf %508, %527 : vector<1x256xf32>
      %c13 = arith.constant 13 : index
      %529 = memref.load %arg3[%c13] : memref<98xf32, #tpu.memory_space<smem>>
      %c62 = arith.constant 62 : index
      %530 = memref.load %arg3[%c62] : memref<98xf32, #tpu.memory_space<smem>>
      %531 = vector.broadcast %529 : f32 to vector<1x256xf32>
      %532 = arith.mulf %531, %513 : vector<1x256xf32>
      %533 = vector.broadcast %530 : f32 to vector<1x256xf32>
      %534 = arith.mulf %533, %517 : vector<1x256xf32>
      %535 = arith.addf %532, %534 : vector<1x256xf32>
      %cst_76 = arith.constant 0.000000e+00 : f32
      %536 = vector.broadcast %cst_76 : f32 to vector<1x32xf32>
      %537 = vector.extract_strided_slice %535 {offsets = [0, 0], sizes = [1, 224], strides = [1, 1]} : vector<1x256xf32> to vector<1x224xf32>
      %538 = tpu.concatenate %536, %537 in 1 : vector<1x32xf32>, vector<1x224xf32> -> vector<1x256xf32>
      %539 = arith.addf %528, %538 : vector<1x256xf32>
      %c20 = arith.constant 20 : index
      %540 = memref.load %arg3[%c20] : memref<98xf32, #tpu.memory_space<smem>>
      %c69 = arith.constant 69 : index
      %541 = memref.load %arg3[%c69] : memref<98xf32, #tpu.memory_space<smem>>
      %542 = vector.broadcast %540 : f32 to vector<1x256xf32>
      %543 = arith.mulf %542, %513 : vector<1x256xf32>
      %544 = vector.broadcast %541 : f32 to vector<1x256xf32>
      %545 = arith.mulf %544, %517 : vector<1x256xf32>
      %546 = arith.addf %543, %545 : vector<1x256xf32>
      %cst_77 = arith.constant 0.000000e+00 : f32
      %547 = vector.broadcast %cst_77 : f32 to vector<1x16xf32>
      %548 = vector.extract_strided_slice %546 {offsets = [0, 0], sizes = [1, 240], strides = [1, 1]} : vector<1x256xf32> to vector<1x240xf32>
      %549 = tpu.concatenate %547, %548 in 1 : vector<1x16xf32>, vector<1x240xf32> -> vector<1x256xf32>
      %550 = arith.addf %539, %549 : vector<1x256xf32>
      %c27 = arith.constant 27 : index
      %551 = memref.load %arg3[%c27] : memref<98xf32, #tpu.memory_space<smem>>
      %c76 = arith.constant 76 : index
      %552 = memref.load %arg3[%c76] : memref<98xf32, #tpu.memory_space<smem>>
      %553 = vector.broadcast %551 : f32 to vector<1x256xf32>
      %554 = arith.mulf %553, %513 : vector<1x256xf32>
      %555 = vector.broadcast %552 : f32 to vector<1x256xf32>
      %556 = arith.mulf %555, %517 : vector<1x256xf32>
      %557 = arith.addf %554, %556 : vector<1x256xf32>
      %558 = arith.addf %550, %557 : vector<1x256xf32>
      %c34 = arith.constant 34 : index
      %559 = memref.load %arg3[%c34] : memref<98xf32, #tpu.memory_space<smem>>
      %c83 = arith.constant 83 : index
      %560 = memref.load %arg3[%c83] : memref<98xf32, #tpu.memory_space<smem>>
      %561 = vector.broadcast %559 : f32 to vector<1x256xf32>
      %562 = arith.mulf %561, %513 : vector<1x256xf32>
      %563 = vector.broadcast %560 : f32 to vector<1x256xf32>
      %564 = arith.mulf %563, %517 : vector<1x256xf32>
      %565 = arith.addf %562, %564 : vector<1x256xf32>
      %cst_78 = arith.constant 0.000000e+00 : f32
      %566 = vector.broadcast %cst_78 : f32 to vector<1x16xf32>
      %567 = vector.extract_strided_slice %565 {offsets = [0, 16], sizes = [1, 240], strides = [1, 1]} : vector<1x256xf32> to vector<1x240xf32>
      %568 = tpu.concatenate %567, %566 in 1 : vector<1x240xf32>, vector<1x16xf32> -> vector<1x256xf32>
      %569 = arith.addf %558, %568 : vector<1x256xf32>
      %c41 = arith.constant 41 : index
      %570 = memref.load %arg3[%c41] : memref<98xf32, #tpu.memory_space<smem>>
      %c90 = arith.constant 90 : index
      %571 = memref.load %arg3[%c90] : memref<98xf32, #tpu.memory_space<smem>>
      %572 = vector.broadcast %570 : f32 to vector<1x256xf32>
      %573 = arith.mulf %572, %513 : vector<1x256xf32>
      %574 = vector.broadcast %571 : f32 to vector<1x256xf32>
      %575 = arith.mulf %574, %517 : vector<1x256xf32>
      %576 = arith.addf %573, %575 : vector<1x256xf32>
      %cst_79 = arith.constant 0.000000e+00 : f32
      %577 = vector.broadcast %cst_79 : f32 to vector<1x32xf32>
      %578 = vector.extract_strided_slice %576 {offsets = [0, 32], sizes = [1, 224], strides = [1, 1]} : vector<1x256xf32> to vector<1x224xf32>
      %579 = tpu.concatenate %578, %577 in 1 : vector<1x224xf32>, vector<1x32xf32> -> vector<1x256xf32>
      %580 = arith.addf %569, %579 : vector<1x256xf32>
      %c48 = arith.constant 48 : index
      %581 = memref.load %arg3[%c48] : memref<98xf32, #tpu.memory_space<smem>>
      %c97 = arith.constant 97 : index
      %582 = memref.load %arg3[%c97] : memref<98xf32, #tpu.memory_space<smem>>
      %583 = vector.broadcast %581 : f32 to vector<1x256xf32>
      %584 = arith.mulf %583, %513 : vector<1x256xf32>
      %585 = vector.broadcast %582 : f32 to vector<1x256xf32>
      %586 = arith.mulf %585, %517 : vector<1x256xf32>
      %587 = arith.addf %584, %586 : vector<1x256xf32>
      %cst_80 = arith.constant 0.000000e+00 : f32
      %588 = vector.broadcast %cst_80 : f32 to vector<1x48xf32>
      %589 = vector.extract_strided_slice %587 {offsets = [0, 48], sizes = [1, 208], strides = [1, 1]} : vector<1x256xf32> to vector<1x208xf32>
      %590 = tpu.concatenate %589, %588 in 1 : vector<1x208xf32>, vector<1x48xf32> -> vector<1x256xf32>
      %591 = arith.addf %580, %590 : vector<1x256xf32>
      %592 = arith.negf %591 : vector<1x256xf32>
      %593 = math.exp %592 : vector<1x256xf32>
      %cst_81 = arith.constant 1.000000e+00 : f32
      %594 = vector.broadcast %cst_81 : f32 to vector<1x256xf32>
      %595 = arith.addf %594, %593 : vector<1x256xf32>
      %596 = arith.divf %594, %595 : vector<1x256xf32>
      %c0_82 = arith.constant 0 : index
      %c0_83 = arith.constant 0 : index
      %c0_84 = arith.constant 0 : index
      %597 = vector.load %arg5[%c0_82, %c0_83, %c0_84] : memref<1x1x256xf32, #tpu.memory_space<vmem>>, vector<1x1x256xf32>
      %598 = vector.shape_cast %597 : vector<1x1x256xf32> to vector<1x256xf32>
      %599 = vector.shape_cast %596 : vector<1x256xf32> to vector<1x1x256xf32>
      tpu.vector_store %arg5[%c0_82, %c0_83, %c0_84], %599 {strides = array<i32>} : memref<1x1x256xf32, #tpu.memory_space<vmem>>, vector<1x1x256xf32>,
    } else {
    }
    return
  }
  func.func @transform_0(%arg0: i32, %arg1: i32) -> (i32, i32, i32) {
    %c0_i32 = arith.constant 0 : i32
    %c0_i32_0 = arith.constant 0 : i32
    return %arg0, %arg1, %c0_i32 : i32, i32, i32
  }
  func.func @transform_1(%arg0: i32, %arg1: i32) -> i32 {
    %c0_i32 = arith.constant 0 : i32
    %c0_i32_0 = arith.constant 0 : i32
    return %c0_i32 : i32
  }
  func.func @transform_2(%arg0: i32, %arg1: i32) -> (i32, i32) {
    %c0_i32 = arith.constant 0 : i32
    %c0_i32_0 = arith.constant 0 : i32
    %c0_i32_1 = arith.constant 0 : i32
    return %c0_i32, %c0_i32_0 : i32, i32
  }
  func.func @transform_3(%arg0: i32, %arg1: i32) -> (i32, i32, i32) {
    %c0_i32 = arith.constant 0 : i32
    %c0_i32_0 = arith.constant 0 : i32
    %c0_i32_1 = arith.constant 0 : i32
    return %arg0, %c0_i32, %c0_i32_0 : i32, i32, i32
  }
}

</mosaic_0001>

<bundles_post_ra>
// kernel: spatial_attention.1
= control target key start
LH: loop header
LB: loop body
LE: loop exit
PB: predicated region body
PF: predicated region fallthrough
CT: control target
= control target key end

     0   :  { %s3138_s0 = inlined_call_operand.vmem [shape: f32[2,4,256], index: 0, kind: input, shape index: {}]   ;;  %s3139_s1 = inlined_call_operand.vmem [shape: f32[98], index: 1, kind: input, shape index: {}]   ;;  %s3140_s2 = inlined_call_operand.vmem [shape: f32[7,256], index: 2, kind: input, shape index: {}]   ;;  %s3141_s3 = inlined_call_operand.vmem [shape: f32[2,1,256], index: 3, kind: output, shape index: {}]  }
   0x1   :  { %3175 = sst [smem:[#allocation21_spill]] %s3138_s0 }
   0x2   :  { %3176 = sst [smem:[#allocation22_spill]] %s3139_s1 }
   0x3   :  { %3177 = sst [smem:[#allocation23_spill]] %s3141_s3 }
   0x4   :  { %8 = vsyncpa [#allocation5], 0  ;;  %s1981_s12 = smov 0   ;;  %s1983_s13 = smov 0  }
   0x5   :  { %s1985_s14 = smov 0  }
   0x6 LB: > { %3178 = sst [smem:[#allocation7_spill]] %s1941_s13  ;;  %s1729_s15 = sadd.s32 4294967295, %s1945_s14   ;;  %s1945_s14 = sphi %s1985_s14, %s14_s14   ;;  %s1941_s13 = sphi %s1983_s13, %s3264_s13   ;;  %s1937_s12 = sphi %s1981_s12, %s3263_s12  }
   0x7   : > { %3179 = sst [smem:[#allocation8_spill]] %s1945_s14  ;;  %s26_s16 = sadd.s32 1, %s1941_s13 }
   0x8   : > { %p28_p0 = scmp.ge.s32.totalorder %s26_s16, 2  ;;  %p1731_p1 = scmp.ge.s32.totalorder %s1945_s14, 1 }
   0x9   : > { %p127_p2 = scmp.lt.s32.totalorder %s1945_s14, 3  ;;  %p2006_p4 = scmp.eq.s32.totalorder %s1729_s15, 0 }
   0xa   : > { %s3266_s16 = smov (%p28_p0, %s26_s16), 0  ;;  %s3183_s1 = sld [smem:[#allocation22_spill]] }
   0xb   : > { %3180 = sst [smem:[#allocation9_spill]] %s3266_s16  ;;  %p2002_p3 = pnand %p1731_p1, %p127_p2 }
   0xd   : > { %p1850_p5 = pneg %p2002_p3 }
   0xf   : > { %p1851_p6 = pnand %p2006_p4, %p1850_p5 }
  0x10   : > { %s140_s21 = sshll.u32 %s3183_s1, 4  ;;  %s141_s21 = int_to_ptr.vmem [resolvable:$true] %s140_s21 }
  0x11   : > { %s1904_s22 = scalar_lea.vmem %s141_s21, 16  ;;  %p1906_p8 = pneg %p1851_p6 }
  0x12   : > { %p1905_p7 = scmp.ne.s32.totalorder %s141_s21, %s1904_s22  ;;  %p1912_p11 = scmp.lt.s32.totalorder %s141_s21, %s141_s21 }
  0x13   : > { %p1913_p12 = scmp.lt.s32.totalorder %s1904_s22, %s1904_s22 }
  0x14   : > { %p1907_p9 = pnand %p1906_p8, %p1905_p7 }
  0x15   : > { %p1914_p13 = por %p1913_p12, %p1912_p11 }
  0x16   : > { %p1908_p10 = pneg %p1907_p9 }
  0x18   : > { %p1915_p0 = pnand %p1914_p13, %p1908_p10 }
  0x1a   : > { %1918 = shalt.err (!%p1915_p0)
}
  0x1b   : > { %s1947_s23 = smov [#allocation4]   ;;  %168 = sbr.rel (%p2002_p3) target bundleno = 516 (0x204), region = 32 }
  0x1c   : > { %1853 = dma.vmem_to_smem (!%p1851_p6), %s141_s21, 16, %s1947_s23, [#allocation5]  }
  0x22   : > { %1932 = dma.done.wait (%p2006_p4), [#allocation5], 16  }
  0x23   : > { %1934 = vsyncadd (%p2006_p4), [#allocation5], 4294967280 }
  0x24   : > { %174 = sfence }
  0x25   : > { %p196_p1 = scmp.lt.s32.totalorder %s1937_s12, 1  ;;  %vm213_vm0 = vcmask 1043456   ;;  %s3185_s0 = sld [smem:[#allocation21_spill]]  ;;  %v1948_v12 = vmov 1966171168   ;;  %v252_v14 = vlaneseq  ;;  %v3187_v40 = vmov 0 }
  0x26   : > { %v250_v13 = vunpack.c.l.s4 %v1948_v12  ;;  %s1949_s28 = smov 2   ;;  %s1950_s29 = smov 3   ;;  %vm358_vm2 = vcmask 23552   ;;  %vm551_vm3 = vcmask 15360   ;;  %vm729_vm4 = vcmask 7168  }
  0x27   : > { %s3268_s12 = smov (!%p196_p1, %s1937_s12), 1  ;;  %v253_v24 = vshrl.u32 %v252_v14, 7  ;;  %vm2035_vm1 = vcmp.lt.s32.totalorder %v252_v14, 256  ;;  %s1951_s30 = smov 1   ;;  %vm411_vm5 = vcmask 392192   ;;  %vm434_vm6 = vcmask 261120  }
  0x28   : > { %3184 = sst [smem:[#allocation10_spill]] %s3268_s12  ;;  %s1845_s24 = sshll.u32 %s3268_s12, 3  ;;  %v251_v23 = vunpack.c.0.s8 %v250_v13  ;;  %v3188_v40 = vsel %vm2035_vm1, 4294967295, %v3187_v40  ;;  %vm1083_vm7 = vcmask 1039360   ;;  %vm457_vm8 = vcmask 130048  }
  0x29   : > { %3189 = vst [vmem:[#allocation12_spill] sm:$0xff] %v3188_v40  ;;  %v2045_v43 = vsub.s32 0, %v253_v24  ;;  %v2047_v44 = vsub.s32 1, %v253_v24  ;;  %s1952_s4 = smov 127   ;;  %s1953_s5 = smov 126   ;;  %vm1261_vm9 = vcmask 1031168  }
  0x2a   : > { %v2031_v34 = vsub.s32 %v251_v23, %v253_v24  ;;  %s1782_s6 = sld [smem:[#allocation4 + $0x3]]  ;;  %s1783_s7 = sld [smem:[#allocation4 + $0x34]]  ;;  %vm492_vm10 = vcmask 916480   ;;  %vm515_vm11 = vcmask 785408   ;;  %vm1439_vm12 = vcmask 1022976  }
  0x2b   : > { %s204_s27 = scalar_lea.vmem %s3185_s0, %s1845_s24  ;;  %s1784_s8 = sld [smem:[#allocation4 + $0xa]]  ;;  %vm538_vm13 = vcmask 654336  }
  0x2c   : > { %v209_v0 = vld [vmem:[%s204_s27] sm:$0xff]  ;;  %3186 = vst [vmem:[#allocation11_spill] sm:$0xff] %v2031_v34  ;;  %s1785_s9 = sld [smem:[#allocation4 + $0x3b]]  ;;  %s1786_s10 = sld [smem:[#allocation4 + $0x11]] }
  0x2d   : > { %v211_v1 = vcombine.high %v209_v0, %v209_v0  ;;  %v214_v2 = vsel %vm213_vm0, %v209_v0, 0.0  ;;  %v228_v3 = vsel %vm213_vm0, %v209_v0, -inf  ;;  %s1787_s11 = sld [smem:[#allocation4 + $0x42]]  ;;  %s1790_s15 = sld [smem:[#allocation4 + $0x1f]] }
  0x2e   : > { %v215_v4 = vrot.slane %v214_v2, 4  ;;  %v229_v5 = vrot.slane %v228_v3, 4  ;;  %s1791_s17 = sld [smem:[#allocation4 + $0x50]]  ;;  %s2063_s18 = sld [smem:[#allocation4 + $0x26]] }
  0x2f   : > { %v235_v6 = vsel %vm213_vm0, %v211_v1, -inf  ;;  %v221_v7 = vsel %vm213_vm0, %v211_v1, 0.0  ;;  %s1954_s19 = smov 125   ;;  %s1793_s20 = sld [smem:[#allocation4 + $0x57]] }
  0x30   : > { %v216_v8 = vadd.f32 %v215_v4, %v214_v2  ;;  %v230_v9 = vmax.f32 %v228_v3, %v229_v5  ;;  %v236_v10 = vrot.slane %v235_v6, 4  ;;  %v222_v11 = vrot.slane %v221_v7, 4  ;;  %s1794_s21 = sld [smem:[#allocation4 + $0x2d]]  ;;  %s1795_s22 = sld [smem:[#allocation4 + $0x5e]] }
  0x31   : > { %v903_v52 = vstv %s1782_s6  ;;  %v905_v53 = vstv %s1783_s7  ;;  %v929_v56 = vstv %s1784_s8  ;;  %s3144_s23 = smov 48   ;;  %s3142_s24 = smov 32  }
  0x32   : > { %v217_v15 = vrot.slane %v216_v8, 2  ;;  %v231_v16 = vrot.slane %v230_v9, 2  ;;  %v237_v17 = vmax.f32 %v235_v6, %v236_v10  ;;  %v223_v18 = vadd.f32 %v222_v11, %v221_v7  ;;  %s3150_s25 = smov 16   ;;  %s3152_s26 = smov 112  }
  0x33   : > { %v931_v57 = vstv %s1785_s9  ;;  %v955_v58 = vstv %s1786_s10  ;;  %v957_v62 = vstv %s1787_s11  ;;  %v1001_v1 = vstv %s1790_s15  ;;  %s3148_s27 = smov 96   ;;  %s2117_s6 = sld [smem:[#allocation4 + $0x7]] }
  0x34   : > { %v218_v19 = vadd.f32 %v217_v15, %v216_v8  ;;  %v232_v20 = vmax.f32 %v230_v9, %v231_v16  ;;  %v238_v21 = vrot.slane %v237_v17, 2  ;;  %v224_v22 = vrot.slane %v223_v18, 2  ;;  %s2119_s7 = sld [smem:[#allocation4 + $0x38]]  ;;  %s2125_s8 = sld [smem:[#allocation4 + $0x3f]] }
  0x35   : > { %v1003_v5 = vstv %s1791_s17  ;;  %v1027_v8 = vstv %s2063_s18  ;;  %v1029_v12 = vstv %s1793_s20  ;;  %s2130_s9 = sld [smem:[#allocation4 + $0xe]]  ;;  %s2138_s10 = sld [smem:[#allocation4 + $0x4d]] }
  0x36   : > { %v219_v25 = vrot.slane %v218_v19, 1  ;;  %v233_v26 = vrot.slane %v232_v20, 1  ;;  %v239_v27 = vmax.f32 %v237_v17, %v238_v21  ;;  %v225_v28 = vadd.f32 %v224_v22, %v223_v18  ;;  %s2145_s11 = sld [smem:[#allocation4 + $0x1c]]  ;;  %s2154_s15 = sld [smem:[#allocation4 + $0x23]] }
  0x37   : > { %v1053_v18 = vstv %s1794_s21  ;;  %s2156_s17 = sld [smem:[#allocation4 + $0x54]]  ;;  %s2174_s18 = sld [smem:[#allocation4 + $0x5b]] }
  0x38   : > { %v220_v29 = vadd.f32 %v219_v25, %v218_v19  ;;  %v234_v30 = vmax.f32 %v232_v20, %v233_v26  ;;  %v240_v31 = vrot.slane %v239_v27, 1  ;;  %v226_v32 = vrot.slane %v225_v28, 1  ;;  %s2179_s20 = sld [smem:[#allocation4 + $0x2a]]  ;;  %s2181_s21 = sld [smem:[#allocation4 + $0x39]] }
  0x39   : > { %v1055_v19 = vstv %s1795_s22  ;;  %s2190_s22 = sld [smem:[#allocation4 + $0x40]]  ;;  %s3191_s0 = smov 96  }
  0x3a   : > { %v241_v33 = vmax.f32 %v239_v27, %v240_v31  ;;  %v227_v35 = vadd.f32 %v226_v32, %v225_v28  ;;  %s3192_s1 = smov 112   ;;  %s2314_s16 = sld [smem:[#allocation4 + $0x25]] }
  0x3b   : > { %s2329_s13 = sld [smem:[#allocation4 + $0x47]]  ;;  %s2333_s14 = sld [smem:[#allocation4 + $0x48]] }
  0x3c   : > { %v271_v36 = vcombine.low %v234_v30, %v241_v33  ;;  %v248_v37 = vcombine.low %v220_v29, %v227_v35  ;;  %v344_v35 = vld [vmem:[%s3140_s2] ss:$8 sm:$0x3]  ;;  %s2339_s3 = sld [smem:[#allocation4 + $0x15]]  ;;  %s2341_s12 = sld [smem:[#allocation4 + $0x46]] }
  0x3e   : > { %v278_v38 = vrot.slane %v271_v36, %v2031_v34  ;;  %v255_v39 = vrot.slane %v248_v37, %v2031_v34 }
  0x40   : > { %v285_v41 = vrot.slane %v278_v38, %v2031_v34  ;;  %v262_v42 = vrot.slane %v255_v39, %v2031_v34  ;;  %v367_v38 = vrot.slane %v344_v35, %v2045_v43  ;;  %3194 = sst [smem:[#allocation15_spill]] %s2314_s16  ;;  %s3199_s16 = smov 16  }
  0x42   : > { %287 = vst.msk [vmem:[#allocation3] sm:$0x3] %vm2035_vm1, %v285_v41  ;;  %268 = vst.msk [vmem:[#allocation2] sm:$0x3] %vm2035_vm1, %v262_v42 }
  0x49   : > { %v2049_v45 = vld [vmem:[#allocation3] sm:$0x3]  ;;  %v341_v48 = vld [vmem:[#allocation2] sm:$0x3] }
  0x4a   : > { %v380_v46 = vrot.slane %v2049_v45, %v2045_v43  ;;  %v384_v47 = vrot.slane %v2049_v45, %v2047_v44  ;;  %v2055_v49 = vmul.f32 0.25, %v341_v48  ;;  %v906_v55 = vmul.f32 %v905_v53, %v2049_v45 }
  0x4b   : > { %v932_v61 = vmul.f32 %v931_v57, %v2049_v45  ;;  %v958_v0 = vmul.f32 %v957_v62, %v2049_v45  ;;  %v1004_v7 = vmul.f32 %v1003_v5, %v2049_v45  ;;  %v1030_v15 = vmul.f32 %v1029_v12, %v2049_v45 }
  0x4c   : > { %569 = vrot.lane.b32.xlu0 %v380_v46, %s1949_s28  ;;  %385 = vrot.lane.b32.xlu1 %v380_v46, %s1950_s29  ;;  %v349_v50 = vrot.slane %v2055_v49, %v2045_v43  ;;  %v353_v51 = vrot.slane %v2055_v49, %v2047_v44  ;;  %v904_v54 = vmul.f32 %v903_v52, %v2055_v49  ;;  %v423_v57 = vstv %s2119_s7  ;;  %s2284_s7 = sld [smem:[#allocation4 + $0x2]] }
  0x4d   : > { %v930_v60 = vmul.f32 %v929_v56, %v2055_v49  ;;  %v956_v63 = vmul.f32 %v955_v58, %v2055_v49  ;;  %v1002_v6 = vmul.f32 %v1001_v1, %v2055_v49  ;;  %v1028_v14 = vmul.f32 %v1027_v8, %v2055_v49 }
  0x4e   : > { %v907_v59 = vadd.f32 %v906_v55, %v904_v54  ;;  %v1054_v23 = vmul.f32 %v1053_v18, %v2055_v49  ;;  %v1056_v24 = vmul.f32 %v1055_v19, %v2049_v45  ;;  %v420_v56 = vstv %s2117_s6  ;;  %v1752_v19 = vld [vmem:[%s3140_s2 + $0x1] ss:$8 sm:$0x3]  ;;  %s2235_s6 = sld [smem:[#allocation4 + $0x5d]] }
  0x4f   : > { %v933_v4 = vadd.f32 %v932_v61, %v930_v60  ;;  %v959_v11 = vadd.f32 %v958_v0, %v956_v63  ;;  %v1005_v13 = vadd.f32 %v1004_v7, %v1002_v6  ;;  %v1031_v21 = vadd.f32 %v1030_v15, %v1028_v14 }
  0x50   : > { %747 = vrot.lane.b32.xlu0 %v380_v46, %s1951_s30  ;;  %387 = vrot.lane.b32.xlu1 %v384_v47, %s1950_s29  ;;  %v912_v2 = vrot.slane %v907_v59, %v2045_v43  ;;  %v916_v3 = vrot.slane %v907_v59, %v2047_v44  ;;  %v1057_v27 = vadd.f32 %v1056_v24, %v1054_v23  ;;  %v446_v63 = vstv %s2125_s8  ;;  %s2207_s8 = sld [smem:[#allocation4 + $0x1]] }
  0x51   : > { %v938_v9 = vrot.slane %v933_v4, %v2045_v43  ;;  %v942_v10 = vrot.slane %v933_v4, %v2047_v44  ;;  %v964_v16 = vrot.slane %v959_v11, %v2045_v43  ;;  %v968_v17 = vrot.slane %v959_v11, %v2047_v44 }
  0x52   : > { %v1010_v20 = vrot.slane %v1005_v13, %v2045_v43  ;;  %v1014_v22 = vrot.slane %v1005_v13, %v2047_v44  ;;  %v1036_v25 = vrot.slane %v1031_v21, %v2045_v43  ;;  %v1040_v26 = vrot.slane %v1031_v21, %v2047_v44 }
  0x53   : > { %v1062_v28 = vrot.slane %v1057_v27, %v2045_v43  ;;  %v1066_v29 = vrot.slane %v1057_v27, %v2047_v44  ;;  %v443_v4 = vstv %s2130_s9  ;;  %v478_v15 = vstv %s2145_s11  ;;  %v1767_v27 = vld [vmem:[%s3140_s2 + $0x2] ss:$8 sm:$0x3]  ;;  %s2209_s9 = sld [smem:[#allocation4 + $0x5c]]  ;;  %s2220_s11 = sld [smem:[#allocation4 + $0x3a]] }
  0x54   : > { %1101 = vrot.lane.b32.xlu0 %v380_v46, %s1952_s4  ;;  %571 = vrot.lane.b32.xlu1 %v384_v47, %s1949_s28  ;;  %v501_v21 = vstv %s2154_s15  ;;  %s2227_s15 = sld [smem:[#allocation4 + $0x41]]  ;;  %3190 = sst [smem:[#allocation13_spill]] %s2235_s6 }
  0x55   : > { %s2386_s6 = sld [smem:[#allocation4 + $0x4b]] }
  0x58   : > { %1279 = vrot.lane.b32.xlu0 %v380_v46, %s1953_s5  ;;  %749 = vrot.lane.b32.xlu1 %v384_v47, %s1951_s30 }
  0x5c   : > { %1103 = vrot.lane.b32.xlu1 %v384_v47, %s1952_s4  ;;  %354 = vrot.lane.b32.xlu0 %v349_v50, %s1950_s29 }
  0x60   : > { %1281 = vrot.lane.b32.xlu1 %v384_v47, %s1953_s5  ;;  %356 = vrot.lane.b32.xlu0 %v353_v51, %s1950_s29  ;;  %s2229_s29 = sld [smem:[#allocation4 + $0x4f]] }
  0x64   : > { %549 = vrot.lane.b32.xlu1 %v353_v51, %s1949_s28  ;;  %547 = vrot.lane.b32.xlu0 %v349_v50, %s1949_s28  ;;  %s3146_s28 = smov 80  }
  0x68   : > { %727 = vrot.lane.b32.xlu1 %v353_v51, %s1951_s30  ;;  %725 = vrot.lane.b32.xlu0 %v349_v50, %s1951_s30  ;;  %s2233_s30 = sld [smem:[#allocation4 + $0x56]] }
  0x6c   : > { %1081 = vrot.lane.b32.xlu1 %v353_v51, %s1952_s4  ;;  %1079 = vrot.lane.b32.xlu0 %v349_v50, %s1952_s4  ;;  %s2107_s4 = sld [smem:[#allocation4 + $0x31]] }
  0x6e   : > { %v3208_v40 = vstv %s2233_s30 }
  0x70   : > { %1259 = vrot.lane.b32.xlu1 %v353_v51, %s1953_s5  ;;  %1257 = vrot.lane.b32.xlu0 %v349_v50, %s1953_s5  ;;  %s2113_s5 = sld [smem:[#allocation4]] }
  0x74   : > { %1437 = vrot.lane.b32.xlu1 %v353_v51, %s1954_s19  ;;  %1435 = vrot.lane.b32.xlu0 %v349_v50, %s1954_s19 }
  0x76   : > { %v397_v53 = vstv %s2113_s5  ;;  %s2202_s5 = sld [smem:[#allocation4 + $0x55]] }
  0x78   : > { %1459 = vrot.lane.b32.xlu1 %v384_v47, %s1954_s19  ;;  %1457 = vrot.lane.b32.xlu0 %v380_v46, %s1954_s19  ;;  %v400_v46 = vstv %s2107_s4  ;;  %v371_v47 = vrot.slane %v344_v35, %v2047_v44  ;;  %s2176_s19 = sld [smem:[#allocation4 + $0x32]]  ;;  %s2200_s4 = sld [smem:[#allocation4 + $0x4e]] }
  0x7c   : > { %917 = vrot.lane.b32.xlu0 %v912_v2, %s3144_s23  ;;  %919 = vrot.lane.b32.xlu1 %v916_v3, %s3144_s23 }
  0x80   : > { %943 = vrot.lane.b32.xlu0 %v938_v9, %s3142_s24  ;;  %945 = vrot.lane.b32.xlu1 %v942_v10, %s3142_s24  ;;  %v481_v10 = vstv %s2138_s10  ;;  %s2218_s10 = sld [smem:[#allocation4 + $0x33]] }
  0x84   : > { %969 = vrot.lane.b32.xlu0 %v964_v16, %s3150_s25  ;;  %971 = vrot.lane.b32.xlu1 %v968_v17, %s3150_s25 }
  0x88   : > { %1015 = vrot.lane.b32.xlu0 %v1010_v20, %s3152_s26  ;;  %1017 = vrot.lane.b32.xlu1 %v1014_v22, %s3152_s26  ;;  %v504_v22 = vstv %s2156_s17  ;;  %s2327_s17 = sld [smem:[#allocation4 + $0x2c]] }
  0x8c   : > { %1041 = vrot.lane.b32.xlu0 %v1036_v25, %s3148_s27  ;;  %1043 = vrot.lane.b32.xlu1 %v1040_v26, %s3148_s27  ;;  %s2274_s27 = sld [smem:[#allocation4 + $0x1d]] }
  0x8e   : > { %3195 = sst [smem:[#allocation16_spill]] %s2327_s17  ;;  %s2851_s17 = sld [smem:[#allocation4 + $0xc]] }
  0x90   : > { %1067 = vrot.lane.b32.xlu0 %v1062_v28, %s3146_s28  ;;  %1069 = vrot.lane.b32.xlu1 %v1066_v29, %s3146_s28  ;;  %s2276_s28 = sld [smem:[#allocation4 + $0x24]] }
  0xbe   : > { %v2100_v30 = vpop.permute.xlu0 %569  ;;  %v386_v31 = vpop.permute.xlu1 %385 }
  0xbf   : > { %v392_v39 = vsel %vm358_vm2, 0.0, %v386_v31 }
  0xc0   : > { %v2127_v45 = vmul.f32 %v392_v39, %v367_v38 }
  0xc2   : > { %v2102_v32 = vpop.permute.xlu0 %747  ;;  %v388_v33 = vpop.permute.xlu1 %387  ;;  %v401_v55 = vmul.f32 %v400_v46, %v2127_v45  ;;  %v424_v3 = vmul.f32 %v423_v57, %v2127_v45  ;;  %v447_v9 = vmul.f32 %v446_v63, %v2127_v45  ;;  %v482_v20 = vmul.f32 %v481_v10, %v2127_v45 }
  0xc3   : > { %v389_v51 = vsel %vm358_vm2, %v386_v31, %v388_v33  ;;  %v560_v33 = vrot.slane %v1752_v19, %v2045_v43 }
  0xc4   : > { %v2147_v58 = vmul.f32 %v389_v51, %v371_v47  ;;  %v1796_v51 = vld [vmem:[%s3140_s2 + $0x4] ss:$8 sm:$0x3] }
  0xc6   : > { %v2109_v36 = vpop.permute.xlu0 %1101  ;;  %v2111_v37 = vpop.permute.xlu1 %571  ;;  %v402_v8 = vmul.f32 %v400_v46, %v2147_v58  ;;  %v425_v18 = vmul.f32 %v423_v57, %v2147_v58  ;;  %v448_v31 = vmul.f32 %v446_v63, %v2147_v58  ;;  %v2248_v57 = vrot.slane %v1767_v27, %v2045_v43 }
  0xca   : > { %v2121_v41 = vpop.permute.xlu0 %1279  ;;  %v2123_v42 = vpop.permute.xlu1 %749 }
  0xce   : > { %v2133_v48 = vpop.permute.xlu1 %1103  ;;  %v355_v50 = vpop.permute.xlu0 %354 }
  0xcf   : > { %v362_v52 = vsel %vm358_vm2, 0.0, %v355_v50 }
  0xd0   : > { %v2140_v54 = vmul.f32 %v367_v38, %v362_v52  ;;  %v505_v38 = vmul.f32 %v504_v22, %v2127_v45 }
  0xd2   : > { %v2149_v59 = vpop.permute.xlu1 %1281  ;;  %v357_v60 = vpop.permute.xlu0 %356  ;;  %v398_v61 = vmul.f32 %v397_v53, %v2140_v54  ;;  %v421_v2 = vmul.f32 %v420_v56, %v2140_v54  ;;  %v444_v13 = vmul.f32 %v443_v4, %v2140_v54  ;;  %v479_v25 = vmul.f32 %v478_v15, %v2140_v54 }
  0xd3   : > { %v359_v62 = vsel %vm358_vm2, %v355_v50, %v357_v60  ;;  %v502_v35 = vmul.f32 %v501_v21, %v2140_v54  ;;  %v527_v50 = vstv %s2174_s18  ;;  %v564_v60 = vrot.slane %v1752_v19, %v2047_v44  ;;  %s2364_s18 = sld [smem:[#allocation4 + $0x16]] }
  0xd4   : > { %v2158_v0 = vmul.f32 %v371_v47, %v359_v62  ;;  %v403_v1 = vadd.f32 %v401_v55, %v398_v61  ;;  %v426_v11 = vadd.f32 %v424_v3, %v421_v2  ;;  %v449_v23 = vadd.f32 %v447_v9, %v444_v13  ;;  %v2254_v61 = vld [vmem:[%s3140_s2 + $0x5] ss:$8 sm:$0x3] }
  0xd5   : > { %v484_v39 = vadd.f32 %v482_v20, %v479_v25  ;;  %v584_v55 = vstv %s2176_s19  ;;  %v628_v2 = vstv %s2190_s22  ;;  %v576_v3 = vsel %vm551_vm3, 0.0, %v2100_v30  ;;  %s3198_s19 = smov 32   ;;  %s3209_s22 = smov 96  }
  0xd6   : > { %v2163_v5 = vpop.permute.xlu1 %549  ;;  %407 = vrot.lane.b32.xlu0 %v403_v1, %s3144_s23  ;;  %v2166_v6 = vpop.permute.xlu0 %547  ;;  %v399_v7 = vmul.f32 %v397_v53, %v2158_v0  ;;  %v422_v14 = vmul.f32 %v420_v56, %v2158_v0  ;;  %v445_v26 = vmul.f32 %v443_v4, %v2158_v0  ;;  %v480_v47 = vmul.f32 %v478_v15, %v2158_v0 }
  0xd7   : > { %v555_v52 = vsel %vm551_vm3, 0.0, %v2166_v6  ;;  %v524_v53 = vstv %s2179_s20  ;;  %v606_v56 = vstv %s2181_s21  ;;  %v483_v1 = vmul.f32 %v481_v10, %v2147_v58  ;;  %s2282_s20 = sld [smem:[#allocation4 + $0x2b]]  ;;  %s3201_s21 = smov 112  }
  0xd8   : > { %v404_v12 = vadd.f32 %v402_v8, %v399_v7  ;;  %v427_v24 = vadd.f32 %v425_v18, %v422_v14  ;;  %v450_v46 = vadd.f32 %v448_v31, %v445_v26  ;;  %v552_v4 = vsel %vm551_vm3, %v2166_v6, %v2163_v5 }
  0xd9   : > { %v507_v7 = vadd.f32 %v505_v38, %v502_v35  ;;  %v528_v8 = vmul.f32 %v527_v50, %v2127_v45  ;;  %v2278_v9 = vmul.f32 %v560_v33, %v555_v52  ;;  %v485_v10 = vadd.f32 %v483_v1, %v480_v47 }
  0xda   : > { %v2183_v16 = vpop.permute.xlu1 %727  ;;  %430 = vrot.lane.b32.xlu0 %v426_v11, %s3142_s24  ;;  %409 = vrot.lane.b32.xlu1 %v404_v12, %s3144_s23  ;;  %v2187_v17 = vpop.permute.xlu0 %725  ;;  %s2244_s23 = sld [smem:[#allocation4 + $0x8]]  ;;  %v525_v11 = vmul.f32 %v524_v53, %v2140_v54  ;;  %v503_v12 = vmul.f32 %v501_v21, %v2158_v0  ;;  %v2287_v5 = vrot.slane %v1767_v27, %v2047_v44  ;;  %v581_v14 = vstv %s2207_s8  ;;  %s2312_s8 = sld [smem:[#allocation4 + $0x1e]] }
  0xdb   : > { %v2290_v6 = vrot.slane %v1796_v51, %v2045_v43  ;;  %v2293_v13 = vrot.slane %v1796_v51, %v2047_v44  ;;  %v2300_v15 = vmul.f32 %v576_v3, %v560_v33  ;;  %v2304_v18 = vrot.slane %v2254_v61, %v2045_v43 }
  0xdc   : > { %v506_v19 = vmul.f32 %v504_v22, %v2147_v58  ;;  %v662_v20 = vstv %s2200_s4  ;;  %v2323_v25 = vmul.f32 %v564_v60, %v552_v4  ;;  %v3166_v22 = vstv %s2202_s5  ;;  %s2720_s4 = sld [smem:[#allocation4 + $0x35]] }
  0xdd   : > { %v3169_v26 = vstv %s2209_s9  ;;  %v530_v27 = vadd.f32 %v528_v8, %v525_v11  ;;  %v526_v33 = vmul.f32 %v524_v53, %v2158_v0  ;;  %v582_v35 = vmul.f32 %v581_v14, %v2278_v9 }
  0xde   : > { %v2211_v28 = vpop.permute.xlu1 %1081  ;;  %453 = vrot.lane.b32.xlu0 %v449_v23, %s3150_s25  ;;  %432 = vrot.lane.b32.xlu1 %v427_v24, %s3142_s24  ;;  %v2215_v29 = vpop.permute.xlu0 %1079  ;;  %s2263_s24 = sld [smem:[#allocation4 + $0xf]]  ;;  %v573_v24 = vsel %vm551_vm3, %v2100_v30, %v2111_v37  ;;  %v508_v31 = vadd.f32 %v506_v19, %v503_v12  ;;  %v3168_v37 = vstv %s2218_s10  ;;  %v3167_v38 = vstv %s2220_s11 }
  0xdf   : > { %v529_v47 = vmul.f32 %v527_v50, %v2147_v58  ;;  %v585_v51 = vmul.f32 %v584_v55, %v2300_v15  ;;  %v659_v3 = vstv %s2274_s27  ;;  %v583_v11 = vmul.f32 %v581_v14, %v2323_v25  ;;  %s2822_s27 = sld [smem:[#allocation4 + $0x58]] }
  0xe0   : > { %3193 = sst [smem:[#allocation14_spill]] %s2312_s8  ;;  %v603_v30 = vstv %s2244_s23  ;;  %s2358_s23 = sld [smem:[#allocation4 + $0x4a]]  ;;  %v681_v12 = vstv %s2276_s28 }
  0xe1   : > { %v587_v8 = vadd.f32 %v585_v51, %v582_v35  ;;  %v629_v35 = vmul.f32 %v628_v2, %v2300_v15  ;;  %s2415_s8 = sld [smem:[#allocation4 + $0x19]]  ;;  %s2827_s28 = sld [smem:[#allocation4 + $0x2e]] }
  0xe2   : > { %v2256_v62 = vpop.permute.xlu1 %1259  ;;  %488 = vrot.lane.b32.xlu0 %v484_v39, %s3152_s26  ;;  %455 = vrot.lane.b32.xlu1 %v450_v46, %s3150_s25  ;;  %v2260_v63 = vpop.permute.xlu0 %1257  ;;  %s2296_s25 = sld [smem:[#allocation4 + $0x9]]  ;;  %s2298_s26 = sld [smem:[#allocation4 + $0x10]]  ;;  %v2343_v46 = vmul.f32 %v573_v24, %v564_v60  ;;  %v754_v39 = vsel %vm729_vm4, 0.0, %v2102_v32 }
  0xe4   : > { %v625_v60 = vstv %s2263_s24  ;;  %s3197_s24 = smov 48  }
  0xe5   : > { %v627_v19 = vmul.f32 %v625_v60, %v2323_v25 }
  0xe6   : > { %511 = vrot.lane.b32.xlu0 %v507_v7, %s3191_s0  ;;  %490 = vrot.lane.b32.xlu1 %v485_v10, %s3192_s1  ;;  %v2316_v21 = vpop.permute.xlu1 %1437  ;;  %v2318_v23 = vpop.permute.xlu0 %1435  ;;  %s3196_s1 = smov 80   ;;  %v531_v7 = vadd.f32 %v529_v47, %v526_v33  ;;  %v604_v10 = vmul.f32 %v603_v30, %v2278_v9  ;;  %v586_v33 = vmul.f32 %v584_v55, %v2343_v46 }
  0xe7   : > { %v605_v55 = vmul.f32 %v603_v30, %v2323_v25  ;;  %v608_v30 = vmul.f32 %v606_v56, %v2343_v46 }
  0xe8   : > { %v588_v4 = vadd.f32 %v586_v33, %v583_v11  ;;  %v1826_v11 = vld [vmem:[%s3140_s2 + $0x6] ss:$8 sm:$0x3] }
  0xe9   : > { %v2435_v50 = vrot.slane %v1826_v11, %v2045_v43 }
  0xea   : > { %534 = vrot.lane.b32.xlu0 %v530_v27, %s3196_s1  ;;  %513 = vrot.lane.b32.xlu1 %v508_v31, %s3191_s0  ;;  %v2354_v53 = vpop.permute.xlu1 %1459  ;;  %v2356_v1 = vpop.permute.xlu0 %1457  ;;  %s2366_s0 = sld [smem:[#allocation4 + $0x17]]  ;;  %v607_v31 = vmul.f32 %v606_v56, %v2300_v15  ;;  %v660_v56 = vmul.f32 %v659_v3, %v2278_v9  ;;  %v707_v27 = vmul.f32 %v3169_v26, %v2300_v15 }
  0xeb   : > { %v683_v26 = vmul.f32 %v681_v12, %v2323_v25 }
  0xec   : > { %v609_v24 = vadd.f32 %v607_v31, %v604_v10  ;;  %v2403_v10 = vrot.slane %v2254_v61, %v2047_v44 }
  0xee   : > { %536 = vrot.lane.b32.xlu1 %v531_v7, %s3196_s1  ;;  %591 = vrot.lane.b32.xlu0 %v587_v8, %s3197_s24  ;;  %v2384_v47 = vpop.permute.xlu0 %917  ;;  %v920_v51 = vpop.permute.xlu1 %919  ;;  %v626_v7 = vmul.f32 %v625_v60, %v2278_v9  ;;  %v663_v60 = vmul.f32 %v662_v20, %v2300_v15 }
  0xef   : > { %v2426_v14 = vsel %vm411_vm5, %v2384_v47, %v920_v51 }
  0xf0   : > { %v631_v61 = vadd.f32 %v629_v35, %v626_v7  ;;  %v2429_v35 = vmul.f32 %v754_v39, %v2248_v57  ;;  %v2432_v7 = vrot.slane %v1826_v11, %v2047_v44  ;;  %v630_v39 = vmul.f32 %v628_v2, %v2343_v46 }
  0xf1   : > { %v685_v2 = vmul.f32 %v3166_v22, %v2300_v15 }
  0xf2   : > { %613 = vrot.lane.b32.xlu0 %v609_v24, %s3198_s19  ;;  %593 = vrot.lane.b32.xlu1 %v588_v4, %s3197_s24  ;;  %v2413_v31 = vpop.permute.xlu0 %943  ;;  %v946_v33 = vpop.permute.xlu1 %945  ;;  %v610_v4 = vadd.f32 %v608_v30, %v605_v55  ;;  %v632_v8 = vadd.f32 %v630_v39, %v627_v19  ;;  %v661_v24 = vmul.f32 %v659_v3, %v2323_v25  ;;  %v3202_v39 = vstv %s2229_s29 }
  0xf3   : > { %v2447_v51 = vsel %vm434_vm6, %v2413_v31, %v946_v33  ;;  %v665_v33 = vadd.f32 %v663_v60, %v660_v56  ;;  %v763_v52 = vmul.f32 %v3168_v37, %v2429_v35  ;;  %v2476_v22 = vmul.f32 %v3167_v38, %v2429_v35 }
  0xf4   : > { %v3200_v56 = vstv %s2227_s15  ;;  %v751_v3 = vsel %vm729_vm4, %v2102_v32, %v2123_v42  ;;  %v664_v60 = vmul.f32 %v662_v20, %v2343_v46  ;;  %v730_v32 = vsel %vm729_vm4, %v2187_v17, %v2183_v16 }
  0xf5   : > { %v2481_v19 = vmul.f32 %v3200_v56, %v2429_v35  ;;  %v2516_v16 = vmul.f32 %v751_v3, %v2287_v5 }
  0xf6   : > { %635 = vrot.lane.b32.xlu0 %v631_v61, %s3199_s16  ;;  %615 = vrot.lane.b32.xlu1 %v610_v4, %s3198_s19  ;;  %v2449_v55 = vpop.permute.xlu0 %969  ;;  %v972_v30 = vpop.permute.xlu1 %971  ;;  %v733_v61 = vsel %vm729_vm4, 0.0, %v2187_v17  ;;  %v682_v4 = vmul.f32 %v681_v12, %v2278_v9  ;;  %v3206_v17 = vstv %s2202_s5  ;;  %s3246_s5 = sld [smem:[#allocation16_spill]] }
  0xf7   : > { %v2465_v11 = vsel %vm457_vm8, %v2449_v55, %v972_v30  ;;  %v2494_v30 = vmul.f32 %v3202_v39, %v2429_v35  ;;  %v2503_v42 = vmul.f32 %v2248_v57, %v733_v61  ;;  %v3205_v39 = vstv %s2282_s20 }
  0xf8   : > { %v704_v37 = vmul.f32 %v3205_v39, %v2278_v9  ;;  %v686_v57 = vmul.f32 %v3206_v17, %v2343_v46  ;;  %v3207_v61 = vstv %s2209_s9  ;;  %v3213_v39 = vstv %s2329_s13  ;;  %s3227_s13 = sld [smem:[#allocation14_spill]]  ;;  %s3247_s9 = sld [smem:[#allocation13_spill]] }
  0xf9   : > { %v2542_v17 = vmul.f32 %v3213_v39, %v2300_v15 }
  0xfa   : > { %669 = vrot.lane.b32.xlu0 %v665_v33, %s3201_s21  ;;  %637 = vrot.lane.b32.xlu1 %v632_v8, %s3199_s16  ;;  %v1016_v56 = vpop.permute.xlu0 %1015  ;;  %v2496_v38 = vpop.permute.xlu1 %1017  ;;  %v687_v8 = vadd.f32 %v685_v2, %v682_v4  ;;  %v666_v33 = vadd.f32 %v664_v60, %v661_v24  ;;  %v2527_v24 = vmul.f32 %v3208_v40, %v2429_v35  ;;  %v3211_v2 = vstv %s2341_s12  ;;  %s2594_s12 = sld [smem:[#allocation4 + $0x1a]] }
  0xfb   : > { %3203 = vst [vmem:[#allocation17_spill] sm:$0xff] %v2496_v38  ;;  %v2507_v20 = vsel %vm492_vm10, %v1016_v56, %v2496_v38  ;;  %v708_v56 = vmul.f32 %v3207_v61, %v2343_v46  ;;  %v470_v3 = vmul.f32 %v3211_v2, %v2127_v45  ;;  %v3212_v60 = vmov %v3211_v2 }
  0xfc   : > { %3204 = vst [vmem:[#allocation18_spill] sm:$0xff] %v2507_v20  ;;  %v471_v40 = vmul.f32 %v3212_v60, %v2147_v58  ;;  %v3215_v45 = vmov %v3213_v39  ;;  %v709_v2 = vadd.f32 %v707_v27, %v704_v37  ;;  %v688_v15 = vadd.f32 %v686_v57, %v683_v26 }
  0xfd   : > { %v2557_v58 = vmul.f32 %v3215_v45, %v2343_v46  ;;  %v3216_v60 = vstv %s2282_s20  ;;  %v3219_v20 = vstv %s2220_s11  ;;  %v3221_v37 = vstv %s2333_s14  ;;  %s2778_s11 = sld [smem:[#allocation4 + $0x12]]  ;;  %s2835_s20 = sld [smem:[#allocation4 + $0x5f]] }
  0xfe   : > { %691 = vrot.lane.b32.xlu0 %v687_v8, %s3209_s22  ;;  %671 = vrot.lane.b32.xlu1 %v666_v33, %s3201_s21  ;;  %v1042_v12 = vpop.permute.xlu0 %1041  ;;  %v2531_v4 = vpop.permute.xlu1 %1043  ;;  %v1105_v8 = vsel %vm1083_vm7, %v2109_v36, %v2133_v48  ;;  %v2548_v33 = vmul.f32 %v2287_v5, %v730_v32  ;;  %v705_v39 = vmul.f32 %v3216_v60, %v2323_v25  ;;  %v3217_v36 = vstv %s2284_s7 }
  0xff   : > { %3210 = vst [vmem:[#allocation19_spill] sm:$0xff] %v2531_v4  ;;  %v2552_v61 = vsel %vm515_vm11, %v1042_v12, %v2531_v4  ;;  %v760_v34 = vmul.f32 %v3217_v36, %v2503_v42  ;;  %v3218_v5 = vstv %s2218_s10  ;;  %v786_v12 = vmul.f32 %v3219_v20, %v2516_v16  ;;  %s2761_s10 = sld [smem:[#allocation4 + $0x3c]] }
 0x100   : > { %3214 = vst [vmem:[#allocation20_spill] sm:$0xff] %v2552_v61  ;;  %v764_v32 = vmul.f32 %v3218_v5, %v2516_v16  ;;  %v3220_v61 = vstv %s2339_s3  ;;  %v2577_v26 = vmul.f32 %v3221_v37, %v2429_v35  ;;  %v1108_v27 = vsel %vm1083_vm7, %v2133_v48, 0.0 }
 0x101   : > { %v467_v46 = vmul.f32 %v3220_v61, %v2140_v54  ;;  %v1283_v57 = vsel %vm1261_vm9, %v2121_v41, %v2149_v59  ;;  %v3222_v20 = vstv %s2227_s15  ;;  %v3223_v61 = vstv %s2229_s29  ;;  %s2793_s15 = sld [smem:[#allocation4 + $0x43]]  ;;  %s2800_s29 = sld [smem:[#allocation4 + $0x20]] }
 0x102   : > { %713 = vrot.lane.b32.xlu0 %v709_v2, %s3196_s1  ;;  %693 = vrot.lane.b32.xlu1 %v688_v15, %s3209_s22  ;;  %v808_v54 = vmul.f32 %v3222_v20, %v2516_v16  ;;  %v2592_v45 = vmul.f32 %v3223_v61, %v2516_v16  ;;  %v2597_v48 = vmul.f32 %v1105_v8, %v2290_v6  ;;  %v1286_v41 = vsel %vm1261_vm9, %v2149_v59, 0.0 }
 0x103   : > { %v1087_v2 = vsel %vm1083_vm7, %v2211_v28, 0.0  ;;  %v3224_v15 = vstv %s2296_s25  ;;  %v710_v36 = vadd.f32 %v708_v56, %v705_v39  ;;  %v765_v5 = vadd.f32 %v763_v52, %v760_v34 }
 0x104   : > { %v782_v60 = vmul.f32 %v3224_v15, %v2503_v42  ;;  %v3225_v37 = vstv %s2284_s7  ;;  %v2609_v61 = vadd.f32 %v470_v3, %v467_v46  ;;  %v2612_v8 = vmul.f32 %v1108_v27, %v2293_v13  ;;  %s2839_s7 = sld [smem:[#allocation4 + $0x5]] }
 0x105   : > { %v761_v20 = vmul.f32 %v3225_v37, %v2548_v33  ;;  %v2615_v59 = vmul.f32 %v1283_v57, %v2304_v18  ;;  %v3226_v4 = vstv %s2339_s3  ;;  %v3228_v15 = vstv %s2333_s14  ;;  %s2636_s3 = sld [smem:[#allocation4 + $0x1b]]  ;;  %s3230_s14 = sld [smem:[#allocation15_spill]] }
 0x106   : > { %v468_v38 = vmul.f32 %v3226_v4, %v2158_v0  ;;  %v830_v34 = vmul.f32 %v3228_v15, %v2516_v16  ;;  %v1084_v52 = vsel %vm1083_vm7, %v2215_v29, %v2211_v28  ;;  %v1265_v56 = vsel %vm1261_vm9, %v2256_v62, 0.0  ;;  %715 = vrot.lane.b32.xlu1 %v710_v36, %s3196_s1  ;;  %769 = vrot.lane.b32.xlu0 %v765_v5, %s3197_s24 }
 0x107   : > { %v1262_v3 = vsel %vm1261_vm9, %v2260_v63, %v2256_v62  ;;  %v3229_v0 = vstv %s2298_s26  ;;  %v2639_v39 = vmul.f32 %v1286_v41, %v2403_v10  ;;  %v2642_v28 = vmul.f32 %v2293_v13, %v1087_v2  ;;  %s2694_s26 = sld [smem:[#allocation4 + $0x4]] }
 0x108   : > { %v804_v4 = vmul.f32 %v3229_v0, %v2503_v42  ;;  %v3231_v29 = vstv %s2296_s25  ;;  %v2647_v63 = vadd.f32 %v471_v40, %v468_v38  ;;  %v787_v46 = vadd.f32 %v2476_v22, %v782_v60  ;;  %s2677_s25 = sld [smem:[#allocation4 + $0x4c]] }
 0x109   : > { %v783_v62 = vmul.f32 %v3231_v29, %v2548_v33  ;;  %v766_v27 = vadd.f32 %v764_v32, %v761_v20  ;;  %v3232_v57 = vstv %s3227_s13  ;;  %v3233_v5 = vmov %v3229_v0  ;;  %s2875_s13 = sld [smem:[#allocation4 + $0x21]] }
 0x10a   : > { %v838_v36 = vmul.f32 %v3232_v57, %v2503_v42  ;;  %v805_v41 = vmul.f32 %v3233_v5, %v2548_v33  ;;  %v2657_v37 = vmul.f32 %v2290_v6, %v1084_v52  ;;  %v2660_v13 = vmul.f32 %v2403_v10, %v1265_v56  ;;  %791 = vrot.lane.b32.xlu0 %v787_v46, %s3198_s19 }
 0x10b   : > { %v2663_v2 = vmul.f32 %v2304_v18, %v1262_v3  ;;  %v1443_v22 = vsel %vm1439_vm12, %v2316_v21, 0.0  ;;  %771 = vrot.lane.b32.xlu1 %v766_v27, %s3197_s24  ;;  %v809_v38 = vadd.f32 %v2481_v19, %v804_v4  ;;  %v3234_v6 = vstv %s3230_s14 }
 0x10c   : > { %v860_v40 = vmul.f32 %v3234_v6, %v2503_v42  ;;  %v1440_v18 = vsel %vm1439_vm12, %v2318_v23, %v2316_v21  ;;  %v1357_v10 = vstv %s2594_s12  ;;  %v788_v32 = vadd.f32 %v786_v12, %v783_v62  ;;  %s2869_s12 = sld [smem:[#allocation4 + $0x44]] }
 0x10d   : > { %v3235_v60 = vmov %v3232_v57  ;;  %v1464_v15 = vsel %vm1439_vm12, %v2354_v53, 0.0  ;;  %v1461_v19 = vsel %vm1439_vm12, %v2356_v1, %v2354_v53  ;;  %v843_v52 = vadd.f32 %v2494_v30, %v838_v36 }
 0x10e   : > { %v839_v20 = vmul.f32 %v3235_v60, %v2548_v33  ;;  %v810_v56 = vadd.f32 %v808_v54, %v805_v41  ;;  %v2689_v21 = vmul.f32 %v2432_v7, %v1443_v22  ;;  %v3236_v23 = vstv %s2364_s18  ;;  %813 = vrot.lane.b32.xlu0 %v809_v38, %s3199_s16  ;;  %s2863_s18 = sld [smem:[#allocation4 + $0x13]] }
 0x10f   : > { %v648_v12 = vmul.f32 %v3236_v23, %v2278_v9  ;;  %v2697_v3 = vmul.f32 %v2435_v50, %v1440_v18  ;;  %v3237_v0 = vmov %v3236_v23  ;;  %v3238_v1 = vstv %s2366_s0  ;;  %793 = vrot.lane.b32.xlu1 %v788_v32, %s3198_s19  ;;  %s2743_s0 = sld [smem:[#allocation4 + $0xb]] }
 0x110   : > { %v649_v53 = vmul.f32 %v3237_v0, %v2323_v25  ;;  %v826_v30 = vmul.f32 %v3238_v1, %v2503_v42  ;;  %v3239_v54 = vmov %v3238_v1  ;;  %v2711_v9 = vmul.f32 %v1464_v15, %v2432_v7 }
 0x111   : > { %v827_v4 = vmul.f32 %v3239_v54, %v2548_v33  ;;  %v2714_v29 = vmul.f32 %v1461_v19, %v2435_v50  ;;  %v2717_v25 = vadd.f32 %v2542_v17, %v648_v12  ;;  %v1535_v62 = vstv %s2636_s3  ;;  %s2883_s3 = sld [smem:[#allocation4 + $0x52]] }
 0x112   : > { %v2723_v46 = vadd.f32 %v2557_v58, %v649_v53  ;;  %v2726_v27 = vadd.f32 %v2577_v26, %v826_v30  ;;  %v3240_v7 = vstv %s2415_s8  ;;  %v3241_v50 = vstv %s2358_s23  ;;  %847 = vrot.lane.b32.xlu0 %v843_v52, %s3201_s21  ;;  %s2845_s8 = sld [smem:[#allocation4 + $0x36]]  ;;  %s2859_s23 = sld [smem:[#allocation4 + $0x3d]] }
 0x113   : > { %v2728_v57 = vadd.f32 %v830_v34, %v827_v4  ;;  %v1181_v36 = vmul.f32 %v3240_v7, %v2642_v28  ;;  %v1183_v5 = vmul.f32 %v3241_v50, %v2597_v48  ;;  %v3242_v17 = vmov %v3241_v50  ;;  %815 = vrot.lane.b32.xlu1 %v810_v56, %s3199_s16 }
 0x114   : > { %v1184_v41 = vmul.f32 %v3242_v17, %v2612_v8  ;;  %v3243_v22 = vmov %v3240_v7  ;;  %v1359_v58 = vmul.f32 %v1357_v10, %v2660_v13  ;;  %v3244_v26 = vstv %s2386_s6  ;;  %s2815_s6 = sld [smem:[#allocation4 + $0x27]] }
 0x115   : > { %v1180_v38 = vmul.f32 %v3243_v22, %v2657_v37  ;;  %v1361_v34 = vmul.f32 %v3244_v26, %v2615_v59  ;;  %v3245_v6 = vmov %v3244_v26  ;;  %v1358_v32 = vmul.f32 %v1357_v10, %v2663_v2 }
 0x116   : > { %v1362_v18 = vmul.f32 %v3245_v6, %v2639_v39  ;;  %v1537_v60 = vmul.f32 %v1535_v62, %v2689_v21  ;;  %v2755_v15 = vadd.f32 %v1184_v41, %v1181_v36  ;;  %v1538_v23 = vstv %s2677_s25  ;;  %s2893_s25 = sld [smem:[#allocation4 + $0x59]] }
 0x117   : > { %v2757_v19 = vadd.f32 %v1183_v5, %v1180_v38  ;;  %v1536_v12 = vmul.f32 %v1535_v62, %v2697_v3  ;;  %v2765_v0 = vadd.f32 %v1361_v34, %v1358_v32  ;;  %v1540_v52 = vmul.f32 %v1538_v23, %v2711_v9 }
 0x118   : > { %v2763_v10 = vadd.f32 %v1362_v18, %v1359_v58  ;;  %v1539_v56 = vmul.f32 %v1538_v23, %v2714_v29  ;;  %v865_v53 = vadd.f32 %v2527_v24, %v860_v40  ;;  %v844_v1 = vadd.f32 %v2592_v45, %v839_v20 }
 0x119   : > { %v3248_v30 = vstv %s3246_s5  ;;  %v3249_v4 = vstv %s3230_s14  ;;  %v1113_v7 = vstv %s2694_s26  ;;  %v2780_v36 = vadd.f32 %v1540_v52, %v1537_v60  ;;  %s2887_s14 = sld [smem:[#allocation4 + $0x28]]  ;;  %s2899_s26 = sld [smem:[#allocation4 + $0x2f]] }
 0x11a   : > { %v882_v54 = vmul.f32 %v3248_v30, %v2503_v42  ;;  %v861_v62 = vmul.f32 %v3249_v4, %v2548_v33  ;;  %v2782_v50 = vadd.f32 %v1539_v56, %v1536_v12  ;;  %869 = vrot.lane.b32.xlu0 %v865_v53, %s3209_s22  ;;  %849 = vrot.lane.b32.xlu1 %v844_v1, %s3201_s21  ;;  %v3250_v24 = vstv %s3247_s9  ;;  %s2913_s5 = sld [smem:[#allocation4 + $0x37]]  ;;  %s2923_s9 = sld [smem:[#allocation4 + $0xd]] }
 0x11b   : > { %v885_v42 = vmul.f32 %v3250_v24, %v2429_v35  ;;  %v3251_v45 = vstv %s2233_s30  ;;  %v1116_v20 = vstv %s2720_s4  ;;  %v3252_v41 = vmov %v3248_v30  ;;  %s2810_s30 = sld [smem:[#allocation4 + $0x51]]  ;;  %s2906_s4 = sld [smem:[#allocation4 + $0x60]] }
 0x11c   : > { %v864_v40 = vmul.f32 %v3251_v45, %v2516_v16  ;;  %v883_v22 = vmul.f32 %v3252_v41, %v2548_v33  ;;  %v1114_v38 = vmul.f32 %v1113_v7, %v2657_v37  ;;  %v1135_v58 = vstv %s2743_s0  ;;  %s2911_s0 = sld [smem:[#allocation4 + $0x6]] }
 0x11d   : > { %v887_v5 = vadd.f32 %v885_v42, %v882_v54  ;;  %v3253_v35 = vmov %v3250_v24  ;;  %v1117_v34 = vmul.f32 %v1116_v20, %v2597_v48  ;;  %v1115_v6 = vmul.f32 %v1113_v7, %v2642_v28 }
 0x11e   : > { %v866_v17 = vadd.f32 %v864_v40, %v861_v62  ;;  %v886_v26 = vmul.f32 %v3253_v35, %v2516_v16  ;;  %v1138_v18 = vstv %s2761_s10  ;;  %v1118_v60 = vmul.f32 %v1116_v20, %v2612_v8  ;;  %s2925_s10 = sld [smem:[#allocation4 + $0x3e]] }
 0x11f   : > { %891 = vrot.lane.b32.xlu0 %v887_v5, %s3196_s1  ;;  %v1119_v32 = vadd.f32 %v1117_v34, %v1114_v38  ;;  %v1136_v23 = vmul.f32 %v1135_v58, %v2657_v37  ;;  %v1157_v12 = vstv %s2778_s11  ;;  %v1139_v16 = vmul.f32 %v1138_v18, %v2597_v48  ;;  %s2938_s11 = sld [smem:[#allocation4 + $0x14]] }
 0x120   : > { %871 = vrot.lane.b32.xlu1 %v866_v17, %s3209_s22  ;;  %v888_v33 = vadd.f32 %v886_v26, %v883_v22  ;;  %v1137_v52 = vmul.f32 %v1135_v58, %v2642_v28  ;;  %v1160_v56 = vstv %s2793_s15  ;;  %v1120_v53 = vadd.f32 %v1118_v60, %v1115_v6  ;;  %s2940_s15 = sld [smem:[#allocation4 + $0x45]] }
 0x121   : > { %v1141_v1 = vadd.f32 %v1139_v16, %v1136_v23  ;;  %v1140_v30 = vmul.f32 %v1138_v18, %v2612_v8  ;;  %v1158_v54 = vmul.f32 %v1157_v12, %v2657_v37  ;;  %v1191_v4 = vstv %s2800_s29  ;;  %s2955_s29 = sld [smem:[#allocation4 + $0x22]] }
 0x122   : > { %v1161_v62 = vmul.f32 %v1160_v56, %v2597_v48  ;;  %v1159_v7 = vmul.f32 %v1157_v12, %v2642_v28  ;;  %v1162_v24 = vmul.f32 %v1160_v56, %v2612_v8  ;;  %v1194_v42 = vstv %s2810_s30  ;;  %s2957_s30 = sld [smem:[#allocation4 + $0x53]] }
 0x123   : > { %1123 = vrot.lane.b32.xlu0 %v1119_v32, %s3197_s24  ;;  %v1142_v45 = vadd.f32 %v1140_v30, %v1137_v52  ;;  %v1192_v20 = vmul.f32 %v1191_v4, %v2657_v37  ;;  %v1213_v5 = vstv %s2815_s6  ;;  %v1195_v17 = vmul.f32 %v1194_v42, %v2597_v48  ;;  %s2963_s6 = sld [smem:[#allocation4 + $0x29]] }
 0x124   : > { %893 = vrot.lane.b32.xlu1 %v888_v33, %s3196_s1  ;;  %v1163_v40 = vadd.f32 %v1161_v62, %v1158_v54  ;;  %v1164_v41 = vadd.f32 %v1162_v24, %v1159_v7  ;;  %v1216_v22 = vstv %s2822_s27  ;;  %v1193_v58 = vmul.f32 %v1191_v4, %v2642_v28  ;;  %s2969_s27 = sld [smem:[#allocation4 + $0x5a]] }
 0x125   : > { %v1197_v38 = vadd.f32 %v1195_v17, %v1192_v20  ;;  %v1196_v35 = vmul.f32 %v1194_v42, %v2612_v8  ;;  %v1214_v26 = vmul.f32 %v1213_v5, %v2657_v37  ;;  %v1235_v34 = vstv %s2827_s28  ;;  %s2977_s28 = sld [smem:[#allocation4 + $0x30]] }
 0x126   : > { %v1217_v6 = vmul.f32 %v1216_v22, %v2597_v48  ;;  %v1215_v18 = vmul.f32 %v1213_v5, %v2642_v28  ;;  %v1218_v33 = vmul.f32 %v1216_v22, %v2612_v8  ;;  %v1238_v32 = vstv %s2835_s20  ;;  %s2981_s20 = sld [smem:[#allocation4 + $0x61]] }
 0x127   : > { %1145 = vrot.lane.b32.xlu0 %v1141_v1, %s3198_s19  ;;  %v1198_v60 = vadd.f32 %v1196_v35, %v1193_v58  ;;  %v1236_v12 = vmul.f32 %v1235_v34, %v2657_v37  ;;  %v1291_v16 = vstv %s2839_s7  ;;  %v1239_v52 = vmul.f32 %v1238_v32, %v2597_v48  ;;  %s3260_s7 = sld [smem:[#allocation23_spill]] }
 0x128   : > { %1125 = vrot.lane.b32.xlu1 %v1120_v53, %s3197_s24  ;;  %v1219_v23 = vadd.f32 %v1217_v6, %v1214_v26  ;;  %v1220_v56 = vadd.f32 %v1218_v33, %v1215_v18  ;;  %v1294_v53 = vstv %s2845_s8  ;;  %v1237_v30 = vmul.f32 %v1235_v34, %v2642_v28 }
 0x129   : > { %v1241_v1 = vadd.f32 %v1239_v52, %v1236_v12  ;;  %v1240_v37 = vmul.f32 %v1238_v32, %v2612_v8  ;;  %v1292_v54 = vmul.f32 %v1291_v16, %v2663_v2  ;;  %v1313_v4 = vstv %s2851_s17 }
 0x12a   : > { %v1295_v48 = vmul.f32 %v1294_v53, %v2615_v59  ;;  %v1293_v62 = vmul.f32 %v1291_v16, %v2660_v13  ;;  %v1296_v7 = vmul.f32 %v1294_v53, %v2639_v39  ;;  %v1316_v24 = vstv %s2859_s23 }
 0x12b   : > { %1167 = vrot.lane.b32.xlu0 %v1163_v40, %s3199_s16  ;;  %v1242_v8 = vadd.f32 %v1240_v37, %v1237_v30  ;;  %v1314_v42 = vmul.f32 %v1313_v4, %v2663_v2  ;;  %v1317_v40 = vmul.f32 %v1316_v24, %v2615_v59  ;;  %v1338_v5 = vstv %s2869_s12  ;;  %v2929_v37 = vpop.permute.xlu0 %1067 }
 0x12c   : > { %1147 = vrot.lane.b32.xlu1 %v1142_v45, %s3198_s19  ;;  %v1297_v28 = vadd.f32 %v1295_v48, %v1292_v54  ;;  %v1335_v45 = vstv %s2863_s18  ;;  %v1298_v20 = vadd.f32 %v1296_v7, %v1293_v62  ;;  %v1318_v22 = vmul.f32 %v1316_v24, %v2639_v39 }
 0x12d   : > { %v1319_v17 = vadd.f32 %v1317_v40, %v1314_v42  ;;  %v1369_v58 = vstv %s2875_s13  ;;  %v1339_v35 = vmul.f32 %v1338_v5, %v2615_v59  ;;  %v1337_v26 = vmul.f32 %v1335_v45, %v2660_v13 }
 0x12e   : > { %v1372_v34 = vstv %s2883_s3  ;;  %v1340_v33 = vmul.f32 %v1338_v5, %v2639_v39  ;;  %v1370_v32 = vmul.f32 %v1369_v58, %v2663_v2  ;;  %v1371_v12 = vmul.f32 %v1369_v58, %v2660_v13 }
 0x12f   : > { %1201 = vrot.lane.b32.xlu0 %v1197_v38, %s3201_s21  ;;  %v1336_v38 = vmul.f32 %v1335_v45, %v2663_v2  ;;  %v1394_v16 = vstv %s2893_s25  ;;  %v1374_v53 = vmul.f32 %v1372_v34, %v2639_v39  ;;  %v1413_v30 = vstv %s2899_s26  ;;  %v2944_v45 = vpop.permute.xlu1 %1069 }
 0x130   : > { %1169 = vrot.lane.b32.xlu1 %v1164_v41, %s3199_s16  ;;  %v1315_v41 = vmul.f32 %v1313_v4, %v2660_v13  ;;  %v1342_v52 = vadd.f32 %v1340_v33, %v1337_v26  ;;  %v1395_v54 = vmul.f32 %v1394_v16, %v2615_v59  ;;  %v1396_v48 = vmul.f32 %v1394_v16, %v2639_v39 }
 0x131   : > { %v1341_v18 = vadd.f32 %v1339_v35, %v1336_v38  ;;  %v1416_v62 = vstv %s2906_s4  ;;  %v1376_v7 = vadd.f32 %v1374_v53, %v1371_v12  ;;  %v1472_v42 = vstv %s2913_s5 }
 0x132   : > { %v1320_v6 = vadd.f32 %v1318_v22, %v1315_v41  ;;  %v1417_v40 = vmul.f32 %v1416_v62, %v2615_v59  ;;  %v1415_v5 = vmul.f32 %v1413_v30, %v2660_v13  ;;  %v1418_v41 = vmul.f32 %v1416_v62, %v2639_v39 }
 0x133   : > { %1223 = vrot.lane.b32.xlu0 %v1219_v23, %s3209_s22  ;;  %v1373_v23 = vmul.f32 %v1372_v34, %v2615_v59  ;;  %v1473_v38 = vmul.f32 %v1472_v42, %v2714_v29  ;;  %v1491_v58 = vstv %s2923_s9  ;;  %v1494_v35 = vstv %s2925_s10 }
 0x134   : > { %1203 = vrot.lane.b32.xlu1 %v1198_v60, %s3201_s21  ;;  %v1391_v60 = vstv %s2887_s14  ;;  %v1474_v39 = vmul.f32 %v1472_v42, %v2711_v9  ;;  %v1420_v34 = vadd.f32 %v1418_v41, %v1415_v5  ;;  %v1495_v33 = vmul.f32 %v1494_v35, %v2714_v29 }
 0x135   : > { %v1393_v4 = vmul.f32 %v1391_v60, %v2660_v13  ;;  %v1493_v12 = vmul.f32 %v1491_v58, %v2689_v21  ;;  %v1496_v53 = vmul.f32 %v1494_v35, %v2711_v9 }
 0x137   : > { %1245 = vrot.lane.b32.xlu0 %v1241_v1, %s3196_s1  ;;  %v1392_v1 = vmul.f32 %v1391_v60, %v2663_v2  ;;  %v1516_v60 = vstv %s2940_s15  ;;  %v1498_v42 = vadd.f32 %v1496_v53, %v1493_v12  ;;  %v1594_v53 = vstv %s2981_s20 }
 0x138   : > { %1225 = vrot.lane.b32.xlu1 %v1220_v56, %s3209_s22  ;;  %v1375_v56 = vadd.f32 %v1373_v23, %v1370_v32  ;;  %v1513_v32 = vstv %s2938_s11 }
 0x139   : > { %v1397_v24 = vadd.f32 %v1395_v54, %v1392_v1  ;;  %v1514_v1 = vmul.f32 %v1513_v32, %v2697_v3  ;;  %v1547_v54 = vstv %s2955_s29  ;;  %v1515_v62 = vmul.f32 %v1513_v32, %v2689_v21 }
 0x13b   : > { %1301 = vrot.lane.b32.xlu0 %v1297_v28, %s3197_s24  ;;  %v1469_v28 = vstv %s2911_s0 }
 0x13c   : > { %1247 = vrot.lane.b32.xlu1 %v1242_v8, %s3196_s1  ;;  %v1414_v8 = vmul.f32 %v1413_v30, %v2663_v2  ;;  %v1470_v22 = vmul.f32 %v1469_v28, %v2697_v3  ;;  %v1471_v59 = vmul.f32 %v1469_v28, %v2689_v21  ;;  %v1517_v30 = vmul.f32 %v1516_v60, %v2714_v29 }
 0x13e   : > { %v1476_v23 = vadd.f32 %v1474_v39, %v1471_v59 }
 0x13f   : > { %1323 = vrot.lane.b32.xlu0 %v1319_v17, %s3198_s19  ;;  %v1419_v17 = vadd.f32 %v1417_v40, %v1414_v8  ;;  %v1519_v40 = vadd.f32 %v1517_v30, %v1514_v1 }
 0x140   : > { %1303 = vrot.lane.b32.xlu1 %v1298_v20, %s3197_s24  ;;  %v1398_v20 = vadd.f32 %v1396_v48, %v1393_v4  ;;  %v1550_v4 = vstv %s2957_s30 }
 0x141   : > { %v1551_v5 = vmul.f32 %v1550_v4, %v2714_v29  ;;  %v1552_v39 = vmul.f32 %v1550_v4, %v2711_v9 }
 0x143   : > { %1345 = vrot.lane.b32.xlu0 %v1341_v18, %s3199_s16  ;;  %v1492_v18 = vmul.f32 %v1491_v58, %v2697_v3  ;;  %v1549_v58 = vmul.f32 %v1547_v54, %v2689_v21 }
 0x144   : > { %1325 = vrot.lane.b32.xlu1 %v1320_v6, %s3198_s19  ;;  %v1475_v6 = vadd.f32 %v1473_v38, %v1470_v22  ;;  %v1572_v22 = vstv %s2969_s27 }
 0x145   : > { %v1554_v30 = vadd.f32 %v1552_v39, %v1549_v58 }
 0x147   : > { %1379 = vrot.lane.b32.xlu0 %v1375_v56, %s3201_s21  ;;  %v1497_v56 = vadd.f32 %v1495_v33, %v1492_v18 }
 0x148   : > { %1347 = vrot.lane.b32.xlu1 %v1342_v52, %s3199_s16  ;;  %v2948_v2 = vpop.permute.xlu0 %407 }
 0x14b   : > { %1401 = vrot.lane.b32.xlu0 %v1397_v24, %s3209_s22  ;;  %v1569_v24 = vstv %s2963_s6 }
 0x14c   : > { %1381 = vrot.lane.b32.xlu1 %v1376_v7, %s3201_s21  ;;  %v410_v13 = vpop.permute.xlu1 %409  ;;  %v431_v26 = vpop.permute.xlu0 %430  ;;  %v1518_v7 = vmul.f32 %v1516_v60, %v2711_v9  ;;  %v1573_v60 = vmul.f32 %v1572_v22, %v2714_v29 }
 0x14d   : > { %v438_v48 = vsel %vm434_vm6, 0.0, %v431_v26  ;;  %v412_v12 = vsel %vm411_vm5, %v2948_v2, %v410_v13 }
 0x14e   : > { %v1520_v59 = vadd.f32 %v1518_v7, %v1515_v62  ;;  %v1595_v7 = vmul.f32 %v1594_v53, %v2714_v29 }
 0x14f   : > { %1423 = vrot.lane.b32.xlu0 %v1419_v17, %s3196_s1  ;;  %v415_v17 = vsel %vm411_vm5, 0.0, %v2948_v2 }
 0x150   : > { %1403 = vrot.lane.b32.xlu1 %v1398_v20, %s3209_s22  ;;  %v433_v16 = vpop.permute.xlu1 %432  ;;  %v454_v52 = vpop.permute.xlu0 %453  ;;  %v1548_v20 = vmul.f32 %v1547_v54, %v2697_v3  ;;  %v439_v38 = vadd.f32 %v438_v48, %v415_v17  ;;  %v1574_v54 = vmul.f32 %v1572_v22, %v2711_v9 }
 0x151   : > { %v461_v41 = vsel %vm457_vm8, 0.0, %v454_v52  ;;  %v435_v35 = vsel %vm434_vm6, %v431_v26, %v433_v16  ;;  %v1571_v26 = vmul.f32 %v1569_v24, %v2689_v21 }
 0x152   : > { %v1553_v32 = vadd.f32 %v1551_v5, %v1548_v20  ;;  %v440_v1 = vadd.f32 %v435_v35, %v412_v12 }
 0x153   : > { %1479 = vrot.lane.b32.xlu0 %v1475_v6, %s3197_s24  ;;  %v462_v6 = vadd.f32 %v461_v41, %v439_v38  ;;  %v1576_v5 = vadd.f32 %v1574_v54, %v1571_v26 }
 0x154   : > { %1425 = vrot.lane.b32.xlu1 %v1420_v34, %s3196_s1  ;;  %v456_v8 = vpop.permute.xlu1 %455  ;;  %v489_v28 = vpop.permute.xlu0 %488  ;;  %v1570_v34 = vmul.f32 %v1569_v24, %v2697_v3 }
 0x155   : > { %v474_v48 = vadd.f32 %v2609_v61, %v462_v6 }
 0x156   : > { %v1575_v62 = vadd.f32 %v1573_v60, %v1570_v34 }
 0x157   : > { %1501 = vrot.lane.b32.xlu0 %v1497_v56, %s3198_s19  ;;  %v458_v56 = vsel %vm457_vm8, %v454_v52, %v456_v8 }
 0x158   : > { %1481 = vrot.lane.b32.xlu1 %v1476_v23, %s3197_s24  ;;  %v491_v18 = vpop.permute.xlu1 %490  ;;  %v512_v33 = vpop.permute.xlu0 %511  ;;  %v1591_v23 = vstv %s2977_s28  ;;  %v463_v2 = vadd.f32 %v458_v56, %v440_v1  ;;  %s1789_s24 = sld [smem:[#allocation4 + $0x49]] }
 0x159   : > { %v493_v16 = vsel %vm492_vm10, %v489_v28, %v491_v18  ;;  %v1592_v4 = vmul.f32 %v1591_v23, %v2697_v3  ;;  %v1593_v24 = vmul.f32 %v1591_v23, %v2689_v21  ;;  %v1596_v3 = vmul.f32 %v1594_v53, %v2711_v9 }
 0x15a   : > { %v475_v61 = vadd.f32 %v2647_v63, %v463_v2  ;;  %v496_v29 = vsel %vm492_vm10, %v491_v18, 0.0 }
 0x15b   : > { %1523 = vrot.lane.b32.xlu0 %v1519_v40, %s3199_s16  ;;  %v1597_v17 = vadd.f32 %v1595_v7, %v1592_v4 }
 0x15c   : > { %1503 = vrot.lane.b32.xlu1 %v1498_v42, %s3198_s19  ;;  %v514_v13 = vpop.permute.xlu1 %513  ;;  %v535_v52 = vpop.permute.xlu0 %534  ;;  %v497_v42 = vadd.f32 %v493_v16, %v474_v48  ;;  %v498_v38 = vadd.f32 %v496_v29, %v475_v61  ;;  %s3258_s19 = sld [smem:[#allocation10_spill]] }
 0x15d   : > { %v516_v8 = vsel %vm515_vm11, %v512_v33, %v514_v13  ;;  %v519_v21 = vsel %vm515_vm11, %v514_v13, 0.0 }
 0x15e   : > { %v520_v28 = vadd.f32 %v516_v8, %v497_v42  ;;  %v521_v6 = vadd.f32 %v519_v21, %v498_v38 }
 0x15f   : > { %1557 = vrot.lane.b32.xlu0 %v1553_v32, %s3201_s21 }
 0x160   : > { %1525 = vrot.lane.b32.xlu1 %v1520_v59, %s3199_s16  ;;  %v537_v40 = vpop.permute.xlu1 %536  ;;  %v592_v20 = vpop.permute.xlu0 %591  ;;  %v1598_v59 = vadd.f32 %v1596_v3, %v1593_v24 }
 0x161   : > { %v539_v41 = vsel %vm538_vm13, %v535_v52, %v537_v40  ;;  %v598_v9 = vsel %vm411_vm5, 0.0, %v592_v20  ;;  %v542_v39 = vsel %vm538_vm13, %v537_v40, 0.0 }
 0x162   : > { %v543_v22 = vadd.f32 %v539_v41, %v520_v28  ;;  %v544_v33 = vadd.f32 %v542_v39, %v521_v6  ;;  %s1738_s16 = sshll.u32 %s3258_s19, 1 }
 0x163   : > { %1579 = vrot.lane.b32.xlu0 %v1575_v62, %s3209_s22  ;;  %s208_s8 = scalar_lea.vmem %s3260_s7, %s1738_s16 }
 0x164   : > { %1559 = vrot.lane.b32.xlu1 %v1554_v30, %s3201_s21  ;;  %v599_v63 = vadd.f32 %v598_v9, %v543_v22  ;;  %v594_v58 = vpop.permute.xlu1 %593  ;;  %v614_v35 = vpop.permute.xlu0 %613 }
 0x165   : > { %v620_v34 = vsel %vm434_vm6, 0.0, %v614_v35  ;;  %v595_v18 = vsel %vm411_vm5, %v592_v20, %v594_v58 }
 0x166   : > { %v621_v32 = vadd.f32 %v620_v34, %v599_v63  ;;  %v600_v53 = vadd.f32 %v595_v18, %v544_v33 }
 0x167   : > { %1601 = vrot.lane.b32.xlu0 %v1597_v17, %s3196_s1 }
 0x168   : > { %1581 = vrot.lane.b32.xlu1 %v1576_v5, %s3209_s22  ;;  %v616_v60 = vpop.permute.xlu1 %615  ;;  %v636_v23 = vpop.permute.xlu0 %635 }
 0x169   : > { %v617_v12 = vsel %vm434_vm6, %v614_v35, %v616_v60  ;;  %v642_v56 = vsel %vm457_vm8, 0.0, %v636_v23 }
 0x16a   : > { %v643_v1 = vadd.f32 %v642_v56, %v621_v32  ;;  %v622_v26 = vadd.f32 %v617_v12, %v600_v53 }
 0x16c   : > { %1603 = vrot.lane.b32.xlu1 %v1598_v59, %s3196_s1  ;;  %v638_v16 = vpop.permute.xlu1 %637  ;;  %v670_v30 = vpop.permute.xlu0 %669  ;;  %v655_v54 = vadd.f32 %v2717_v25, %v643_v1  ;;  %s1788_s1 = sld [smem:[#allocation4 + $0x18]] }
 0x16d   : > { %v639_v4 = vsel %vm457_vm8, %v636_v23, %v638_v16 }
 0x16e   : > { %v644_v48 = vadd.f32 %v639_v4, %v622_v26 }
 0x170   : > { %v672_v2 = vpop.permute.xlu1 %671  ;;  %v656_v13 = vadd.f32 %v2723_v46, %v644_v48  ;;  %v692_v52 = vpop.permute.xlu0 %691  ;;  %v983_v48 = vstv %s1789_s24 }
 0x171   : > { %v673_v62 = vsel %vm492_vm10, %v670_v30, %v672_v2  ;;  %v676_v40 = vsel %vm492_vm10, %v672_v2, 0.0 }
 0x172   : > { %v677_v24 = vadd.f32 %v673_v62, %v655_v54  ;;  %v678_v17 = vadd.f32 %v676_v40, %v656_v13  ;;  %v981_v4 = vstv %s1788_s1 }
 0x174   : > { %v694_v7 = vpop.permute.xlu1 %693  ;;  %v714_v8 = vpop.permute.xlu0 %713 }
 0x175   : > { %v695_v42 = vsel %vm515_vm11, %v692_v52, %v694_v7  ;;  %v698_v5 = vsel %vm515_vm11, %v694_v7, 0.0 }
 0x176   : > { %v699_v3 = vadd.f32 %v695_v42, %v677_v24  ;;  %v700_v38 = vadd.f32 %v698_v5, %v678_v17  ;;  %v1903_v42 = vld [vmem:[#allocation3] sm:$0x3]  ;;  %v924_v17 = vsel %vm411_vm5, 0.0, %v2384_v47 }
 0x177   : > { %v984_v24 = vmul.f32 %v1903_v42, %v983_v48 }
 0x178   : > { %v716_v61 = vpop.permute.xlu1 %715  ;;  %v770_v28 = vpop.permute.xlu0 %769 }
 0x179   : > { %v717_v25 = vsel %vm538_vm13, %v714_v8, %v716_v61  ;;  %v776_v46 = vsel %vm411_vm5, 0.0, %v770_v28  ;;  %v720_v21 = vsel %vm538_vm13, %v716_v61, 0.0  ;;  %v982_v8 = vmul.f32 %v981_v4, %v2055_v49 }
 0x17a   : > { %v721_v20 = vadd.f32 %v717_v25, %v699_v3  ;;  %v722_v58 = vadd.f32 %v720_v21, %v700_v38  ;;  %v950_v21 = vsel %vm434_vm6, 0.0, %v2413_v31 }
 0x17c   : > { %v777_v29 = vadd.f32 %v776_v46, %v721_v20  ;;  %v792_v22 = vpop.permute.xlu0 %791  ;;  %v985_v46 = vadd.f32 %v984_v24, %v982_v8 }
 0x17d   : > { %v772_v41 = vpop.permute.xlu1 %771  ;;  %v798_v9 = vsel %vm434_vm6, 0.0, %v792_v22 }
 0x17e   : > { %v773_v63 = vsel %vm411_vm5, %v770_v28, %v772_v41  ;;  %v799_v35 = vadd.f32 %v798_v9, %v777_v29 }
 0x17f   : > { %v778_v18 = vadd.f32 %v773_v63, %v722_v58  ;;  %v990_v63 = vrot.slane %v985_v46, %v2045_v43  ;;  %v994_v58 = vrot.slane %v985_v46, %v2047_v44 }
 0x180   : > { %v814_v39 = vpop.permute.xlu0 %813 }
 0x181   : > { %v794_v59 = vpop.permute.xlu1 %793  ;;  %v820_v6 = vsel %vm457_vm8, 0.0, %v814_v39 }
 0x182   : > { %v795_v34 = vsel %vm434_vm6, %v792_v22, %v794_v59  ;;  %v821_v33 = vadd.f32 %v820_v6, %v799_v35  ;;  %v976_v35 = vsel %vm457_vm8, 0.0, %v2449_v55 }
 0x183   : > { %v800_v32 = vadd.f32 %v795_v34, %v778_v18  ;;  %v3254_v18 = vld [vmem:[#allocation17_spill] sm:$0xff] }
 0x184   : > { %v848_v23 = vpop.permute.xlu0 %847  ;;  %v833_v12 = vadd.f32 %v2726_v27, %v821_v33  ;;  %v1022_v31 = vsel %vm492_vm10, %v3254_v18, 0.0  ;;  %v3255_v33 = vld [vmem:[#allocation18_spill] sm:$0xff] }
 0x185   : > { %v816_v60 = vpop.permute.xlu1 %815 }
 0x186   : > { %v817_v56 = vsel %vm457_vm8, %v814_v39, %v816_v60 }
 0x187   : > { %v822_v53 = vadd.f32 %v817_v56, %v800_v32 }
 0x189   : > { %v834_v26 = vadd.f32 %v2728_v57, %v822_v53  ;;  %v1074_v53 = vsel %vm538_vm13, %v2944_v45, 0.0 }
 0x18c   : > { %v850_v1 = vpop.permute.xlu1 %849  ;;  %v870_v16 = vpop.permute.xlu0 %869 }
 0x18d   : > { %v851_v30 = vsel %vm492_vm10, %v848_v23, %v850_v1  ;;  %v854_v54 = vsel %vm492_vm10, %v850_v1, 0.0  ;;  %v3256_v23 = vld [vmem:[#allocation19_spill] sm:$0xff] }
 0x18e   : > { %v855_v27 = vadd.f32 %v851_v30, %v833_v12  ;;  %v856_v7 = vadd.f32 %v854_v54, %v834_v26  ;;  %v1048_v44 = vsel %vm515_vm11, %v3256_v23, 0.0  ;;  %v3257_v12 = vld [vmem:[#allocation20_spill] sm:$0xff] }
 0x191   : > { %v892_v13 = vpop.permute.xlu0 %891 }
 0x192   : > { %v872_v2 = vpop.permute.xlu1 %871 }
 0x193   : > { %v873_v52 = vsel %vm515_vm11, %v870_v16, %v872_v2  ;;  %v876_v62 = vsel %vm515_vm11, %v872_v2, 0.0 }
 0x194   : > { %v877_v57 = vadd.f32 %v873_v52, %v855_v27  ;;  %v878_v3 = vadd.f32 %v876_v62, %v856_v7 }
 0x195   : > { %v1124_v28 = vpop.permute.xlu0 %1123 }
 0x196   : > { %v894_v61 = vpop.permute.xlu1 %893  ;;  %v1130_v54 = vsel %vm411_vm5, 0.0, %v1124_v28 }
 0x197   : > { %v895_v40 = vsel %vm538_vm13, %v892_v13, %v894_v61  ;;  %v898_v25 = vsel %vm538_vm13, %v894_v61, 0.0 }
 0x198   : > { %v899_v20 = vadd.f32 %v895_v40, %v877_v57  ;;  %v900_v5 = vadd.f32 %v898_v25, %v878_v3 }
 0x199   : > { %v1146_v22 = vpop.permute.xlu0 %1145 }
 0x19a   : > { %v925_v29 = vadd.f32 %v924_v17, %v899_v20  ;;  %v926_v41 = vadd.f32 %v2426_v14, %v900_v5  ;;  %v1126_v49 = vpop.permute.xlu1 %1125  ;;  %v1152_v13 = vsel %vm434_vm6, 0.0, %v1146_v22 }
 0x19b   : > { %v1127_v4 = vsel %vm411_vm5, %v1124_v28, %v1126_v49 }
 0x19c   : > { %v951_v9 = vadd.f32 %v950_v21, %v925_v29  ;;  %v952_v38 = vadd.f32 %v2447_v51, %v926_v41 }
 0x19d   : > { %v1168_v14 = vpop.permute.xlu0 %1167 }
 0x19e   : > { %v977_v59 = vadd.f32 %v976_v35, %v951_v9  ;;  %v978_v47 = vadd.f32 %v2465_v11, %v952_v38  ;;  %v1148_v39 = vpop.permute.xlu1 %1147  ;;  %v1071_v11 = vsel %vm538_vm13, %v2929_v37, %v2944_v45  ;;  %v1174_v45 = vsel %vm457_vm8, 0.0, %v1168_v14 }
 0x19f   : > { %v1149_v52 = vsel %vm434_vm6, %v1146_v22, %v1148_v39 }
 0x1a0   : > { %v997_v34 = vadd.f32 %v990_v63, %v977_v59  ;;  %v998_v6 = vadd.f32 %v994_v58, %v978_v47 }
 0x1a1   : > { %v1202_v43 = vpop.permute.xlu0 %1201 }
 0x1a2   : > { %v1023_v32 = vadd.f32 %v3255_v33, %v997_v34  ;;  %v1024_v51 = vadd.f32 %v1022_v31, %v998_v6  ;;  %v1170_v60 = vpop.permute.xlu1 %1169 }
 0x1a3   : > { %v1171_v8 = vsel %vm457_vm8, %v1168_v14, %v1170_v60 }
 0x1a4   : > { %v1049_v55 = vadd.f32 %v3257_v12, %v1023_v32  ;;  %v1050_v56 = vadd.f32 %v1048_v44, %v1024_v51 }
 0x1a5   : > { %v1224_v30 = vpop.permute.xlu0 %1223 }
 0x1a6   : > { %v1075_v1 = vadd.f32 %v1071_v11, %v1049_v55  ;;  %v1076_v26 = vadd.f32 %v1074_v53, %v1050_v56  ;;  %v1204_v16 = vpop.permute.xlu1 %1203 }
 0x1a7   : > { %v1205_v40 = vsel %vm492_vm10, %v1202_v43, %v1204_v16  ;;  %v1208_v25 = vsel %vm492_vm10, %v1204_v16, 0.0 }
 0x1a8   : > { %v1131_v48 = vadd.f32 %v1130_v54, %v1075_v1  ;;  %v1132_v2 = vadd.f32 %v1127_v4, %v1076_v26 }
 0x1a9   : > { %v1246_v7 = vpop.permute.xlu0 %1245 }
 0x1aa   : > { %v1153_v62 = vadd.f32 %v1152_v13, %v1131_v48  ;;  %v1154_v27 = vadd.f32 %v1149_v52, %v1132_v2  ;;  %v1226_v37 = vpop.permute.xlu1 %1225 }
 0x1ab   : > { %v1227_v46 = vsel %vm515_vm11, %v1224_v30, %v1226_v37  ;;  %v1230_v17 = vsel %vm515_vm11, %v1226_v37, 0.0 }
 0x1ac   : > { %v1175_v42 = vadd.f32 %v1174_v45, %v1153_v62  ;;  %v1176_v24 = vadd.f32 %v1171_v8, %v1154_v27 }
 0x1ad   : > { %v1302_v28 = vpop.permute.xlu0 %1301 }
 0x1ae   : > { %v1187_v57 = vadd.f32 %v2757_v19, %v1175_v42  ;;  %v1188_v3 = vadd.f32 %v2755_v15, %v1176_v24  ;;  %v1248_v61 = vpop.permute.xlu1 %1247  ;;  %v1308_v38 = vsel %vm411_vm5, 0.0, %v1302_v28 }
 0x1af   : > { %v1249_v19 = vsel %vm538_vm13, %v1246_v7, %v1248_v61  ;;  %v1252_v15 = vsel %vm538_vm13, %v1248_v61, 0.0 }
 0x1b0   : > { %v1209_v20 = vadd.f32 %v1205_v40, %v1187_v57  ;;  %v1210_v5 = vadd.f32 %v1208_v25, %v1188_v3 }
 0x1b1   : > { %v1324_v22 = vpop.permute.xlu0 %1323 }
 0x1b2   : > { %v1231_v29 = vadd.f32 %v1227_v46, %v1209_v20  ;;  %v1232_v41 = vadd.f32 %v1230_v17, %v1210_v5  ;;  %v1304_v49 = vpop.permute.xlu1 %1303  ;;  %v1330_v39 = vsel %vm434_vm6, 0.0, %v1324_v22 }
 0x1b3   : > { %v1305_v63 = vsel %vm411_vm5, %v1302_v28, %v1304_v49 }
 0x1b4   : > { %v1253_v21 = vadd.f32 %v1249_v19, %v1231_v29  ;;  %v1254_v9 = vadd.f32 %v1252_v15, %v1232_v41 }
 0x1b5   : > { %v1346_v47 = vpop.permute.xlu0 %1345 }
 0x1b6   : > { %v1309_v58 = vadd.f32 %v1308_v38, %v1253_v21  ;;  %v1310_v35 = vadd.f32 %v1305_v63, %v1254_v9  ;;  %v1326_v59 = vpop.permute.xlu1 %1325  ;;  %v1352_v6 = vsel %vm457_vm8, 0.0, %v1346_v47 }
 0x1b7   : > { %v1327_v14 = vsel %vm434_vm6, %v1324_v22, %v1326_v59 }
 0x1b8   : > { %v1331_v34 = vadd.f32 %v1330_v39, %v1309_v58  ;;  %v1332_v18 = vadd.f32 %v1327_v14, %v1310_v35 }
 0x1b9   : > { %v1380_v32 = vpop.permute.xlu0 %1379 }
 0x1ba   : > { %v1353_v31 = vadd.f32 %v1352_v6, %v1331_v34  ;;  %v1348_v33 = vpop.permute.xlu1 %1347 }
 0x1bb   : > { %v1349_v51 = vsel %vm457_vm8, %v1346_v47, %v1348_v33 }
 0x1bc   : > { %v1354_v60 = vadd.f32 %v1349_v51, %v1332_v18  ;;  %v1365_v43 = vadd.f32 %v2765_v0, %v1353_v31 }
 0x1bd   : > { %v1402_v12 = vpop.permute.xlu0 %1401 }
 0x1be   : > { %v1382_v23 = vpop.permute.xlu1 %1381  ;;  %v1366_v44 = vadd.f32 %v2763_v10, %v1354_v60 }
 0x1bf   : > { %v1383_v55 = vsel %vm492_vm10, %v1380_v32, %v1382_v23  ;;  %v1386_v54 = vsel %vm492_vm10, %v1382_v23, 0.0 }
 0x1c0   : > { %v1387_v1 = vadd.f32 %v1383_v55, %v1365_v43  ;;  %v1388_v2 = vadd.f32 %v1386_v54, %v1366_v44  ;;  %v3259_v44 = vld [vmem:[#allocation11_spill] sm:$0xff] }
 0x1c1   : > { %v1424_v11 = vpop.permute.xlu0 %1423 }
 0x1c2   : > { %v1404_v56 = vpop.permute.xlu1 %1403 }
 0x1c3   : > { %v1405_v53 = vsel %vm515_vm11, %v1402_v12, %v1404_v56  ;;  %v1408_v0 = vsel %vm515_vm11, %v1404_v56, 0.0 }
 0x1c4   : > { %v1409_v26 = vadd.f32 %v1405_v53, %v1387_v1  ;;  %v1410_v7 = vadd.f32 %v1408_v0, %v1388_v2 }
 0x1c5   : > { %v1480_v30 = vpop.permute.xlu0 %1479 }
 0x1c6   : > { %v1426_v16 = vpop.permute.xlu1 %1425  ;;  %v1486_v10 = vsel %vm411_vm5, 0.0, %v1480_v30 }
 0x1c7   : > { %v1427_v4 = vsel %vm538_vm13, %v1424_v11, %v1426_v16  ;;  %v1430_v27 = vsel %vm538_vm13, %v1426_v16, 0.0 }
 0x1c8   : > { %v1431_v48 = vadd.f32 %v1427_v4, %v1409_v26  ;;  %v1432_v8 = vadd.f32 %v1430_v27, %v1410_v7 }
 0x1c9   : > { %v1502_v62 = vpop.permute.xlu0 %1501 }
 0x1ca   : > { %v1487_v13 = vadd.f32 %v1486_v10, %v1431_v48  ;;  %v1482_v52 = vpop.permute.xlu1 %1481  ;;  %v1508_v37 = vsel %vm434_vm6, 0.0, %v1502_v62 }
 0x1cb   : > { %v1483_v45 = vsel %vm411_vm5, %v1480_v30, %v1482_v52 }
 0x1cc   : > { %v1509_v42 = vadd.f32 %v1508_v37, %v1487_v13  ;;  %v1488_v28 = vadd.f32 %v1483_v45, %v1432_v8 }
 0x1cd   : > { %v1524_v57 = vpop.permute.xlu0 %1523 }
 0x1ce   : > { %v1504_v24 = vpop.permute.xlu1 %1503  ;;  %v1530_v61 = vsel %vm457_vm8, 0.0, %v1524_v57 }
 0x1cf   : > { %v1505_v3 = vsel %vm434_vm6, %v1502_v62, %v1504_v24  ;;  %v1531_v40 = vadd.f32 %v1530_v61, %v1509_v42 }
 0x1d0   : > { %v1510_v25 = vadd.f32 %v1505_v3, %v1488_v28 }
 0x1d1   : > { %v1558_v5 = vpop.permute.xlu0 %1557  ;;  %v1543_v46 = vadd.f32 %v2782_v50, %v1531_v40 }
 0x1d2   : > { %v1526_v20 = vpop.permute.xlu1 %1525 }
 0x1d3   : > { %v1527_v17 = vsel %vm457_vm8, %v1524_v57, %v1526_v20 }
 0x1d4   : > { %v1532_v29 = vadd.f32 %v1527_v17, %v1510_v25 }
 0x1d5   : > { %v1580_v22 = vpop.permute.xlu0 %1579 }
 0x1d6   : > { %v1560_v41 = vpop.permute.xlu1 %1559  ;;  %v1544_v49 = vadd.f32 %v2780_v36, %v1532_v29 }
 0x1d7   : > { %v1561_v19 = vsel %vm492_vm10, %v1558_v5, %v1560_v41  ;;  %v1564_v15 = vsel %vm492_vm10, %v1560_v41, 0.0 }
 0x1d8   : > { %v1565_v63 = vadd.f32 %v1561_v19, %v1543_v46  ;;  %v1566_v58 = vadd.f32 %v1564_v15, %v1544_v49 }
 0x1d9   : > { %v1602_v59 = vpop.permute.xlu0 %1601 }
 0x1da   : > { %v1582_v21 = vpop.permute.xlu1 %1581 }
 0x1db   : > { %v1583_v9 = vsel %vm515_vm11, %v1580_v22, %v1582_v21  ;;  %v1586_v38 = vsel %vm515_vm11, %v1582_v21, 0.0 }
 0x1dc   : > { %v1587_v35 = vadd.f32 %v1583_v9, %v1565_v63  ;;  %v1588_v50 = vadd.f32 %v1586_v38, %v1566_v58 }
 0x1de   : > { %v1604_v47 = vpop.permute.xlu1 %1603 }
 0x1df   : > { %v1605_v39 = vsel %vm538_vm13, %v1602_v59, %v1604_v47  ;;  %v1608_v36 = vsel %vm538_vm13, %v1604_v47, 0.0 }
 0x1e0   : > { %v1609_v14 = vadd.f32 %v1605_v39, %v1587_v35  ;;  %v1610_v34 = vadd.f32 %v1608_v36, %v1588_v50 }
 0x1e2   : > { %v1841_v6 = vmul.f32 -1.442695, %v1609_v14  ;;  %v1842_v18 = vmul.f32 -1.442695, %v1610_v34 }
 0x1e4   : > { %1895 = vpow2.f32 %v1841_v6 }
 0x1e5   : > { %1897 = vpow2.f32 %v1842_v18 }
 0x1ee   : > { %v1896_v31 = vpop.eup %1895 }
 0x1ef   : > { %v1898_v33 = vpop.eup %1897  ;;  %v1617_v32 = vadd.f32 1.0, %v1896_v31 }
 0x1f0   : > { %v1618_v51 = vadd.f32 1.0, %v1898_v33 }
 0x1f1   : > { %1899 = vrcp.f32 %v1617_v32 }
 0x1f2   : > { %1901 = vrcp.f32 %v1618_v51 }
 0x1fb   : > { %v1900_v60 = vpop.eup %1899 }
 0x1fc   : > { %v1902_v43 = vpop.eup %1901 }
 0x1fd   : > { %v1625_v23 = vcombine.low %v1900_v60, %v1902_v43 }
 0x1ff   : > { %v1632_v12 = vrot.slane %v1625_v23, %v3259_v44 }
 0x201   : > { %v1639_v55 = vrot.slane %v1632_v12, %v3259_v44 }
 0x203   : > { %1645 = vst.msk [vmem:[%s208_s8] sm:$0x3] %vm2035_vm1, %v1639_v55 }
 0x204 PF: > { %s3262_s17 = sld [smem:[#allocation8_spill]]  ;;  %s3263_s12 = sld [smem:[#allocation7_spill]] }
 0x205   : > { %s3264_s13 = sld [smem:[#allocation9_spill]] }
 0x20a   : > { %s14_s14 = sadd.s32 1, %s3262_s17  }
 0x20b   : > { %p11_p2 = scmp.ge.s32.totalorder %s14_s14, 4  }
 0x20d   :  { %13 = sbr.rel (!%p11_p2) target bundleno = 6 (0x6), region = 84 }
 0x214   :  { %1665 = vsyncpa [#allocation5], 1 }
 0x215   :  { %1667 = vsyncpa [#allocation5 + $0x1], 1 }

</bundles_post_ra>
